<compile_context>
chip_gen: v7x
topology: tpu7x:2x2x1
jax: 0.10.0
libtpu: 0.0.40
codegen_flags: <defaults>
</compile_context>

<pallas_src>
import functools

import jax
import jax.numpy as jnp
from jax.experimental import pallas as pl
from jax.experimental.pallas import tpu as pltpu


def _round_up(x, m):
    return (x + m - 1) // m * m


def _pad2(a, rows, cols, value=0.0):
    return jnp.pad(a, ((0, rows - a.shape[0]), (0, cols - a.shape[1])),
                   constant_values=value)


def _tiling(n):
    """Return (n_pad, tm, tk) for the (row-tile, reduction-tile) grid."""
    n_pad = _round_up(max(n, 1), 128)
    if n_pad <= 512:
        # Small graph: single full-array tile each way, lane/sublane aligned.
        return n_pad, n_pad, n_pad
    # Tiled path: pad to a multiple of 256 when a >=512 row tile still divides
    # it, otherwise accept <=511 rows of padding so a large tm divides n_pad
    # (the repeated x re-stream shrinks linearly with tm).
    n_pad = _round_up(n, 256)
    if n_pad % 512 != 0:
        n_pad = _round_up(n, 512)
    tm = next(t for t in (2048, 1024, 512) if n_pad % t == 0)
    tk = 256
    return n_pad, tm, tk


def _sage_layer_kernel(a_ref, xk_ref, xi_ref, invdeg_ref, wl_ref, wr_ref,
                       b_ref, o_ref, acc_ref, *, apply_relu,
                       apply_log_softmax, valid_out):
    k = pl.program_id(1)

    @pl.when(k == 0)
    def _():
        acc_ref[...] = jnp.zeros_like(acc_ref)

    # Inner reduction step: int8 A tile (exact 0/1/small counts) widened to
    # bf16 on the VPU (hidden under DMA), bf16 features straight from HBM,
    # f32 accumulation on the MXU.
    acc_ref[...] += jnp.dot(a_ref[...].astype(jnp.bfloat16), xk_ref[...],
                            preferred_element_type=jnp.float32)

    @pl.when(k == pl.num_programs(1) - 1)
    def _():
        # Exact mean aggregation: per-row 1/deg applied once, in f32, then
        # cast to bf16 for a single-pass MXU finalize matmul.
        agg = (acc_ref[...] * invdeg_ref[...]).astype(jnp.bfloat16)
        # SAGEConv: lin_l(mean_aggregated) + lin_r(self); bias only on lin_l.
        out = (jnp.dot(agg, wl_ref[...], preferred_element_type=jnp.float32)
               + jnp.dot(xi_ref[...], wr_ref[...],
                         preferred_element_type=jnp.float32)
               + b_ref[...])
        if apply_relu:
            out = jnp.maximum(out, 0.0)
        if apply_log_softmax:
            # log_softmax over the first `valid_out` (real) lanes only; the
            # zero-padded lanes are excluded from the max/sum and sliced off
            # by the wrapper.
            lane = jax.lax.broadcasted_iota(jnp.int32, out.shape, 1)
            mask = lane < valid_out
            m = jnp.max(jnp.where(mask, out, -jnp.inf), axis=1, keepdims=True)
            s = out - m
            denom = jnp.sum(jnp.where(mask, jnp.exp(s), 0.0), axis=1,
                            keepdims=True)
            out = s - jnp.log(denom)
        o_ref[...] = out.astype(o_ref.dtype)


def sage_layer(adj_i8, inv_deg, x_bf16, w_l, w_r, b, *, apply_relu=False,
               apply_log_softmax=False, valid_out, tm, tk, out_dtype):
    """One SAGEConv layer, tiled over (output-row tiles, reduction tiles)."""
    n_pad = adj_i8.shape[0]
    c_pad = x_bf16.shape[1]
    h_pad = w_l.shape[1]

    kernel = functools.partial(
        _sage_layer_kernel,
        apply_relu=apply_relu,
        apply_log_softmax=apply_log_softmax,
        valid_out=valid_out,
    )

    # Deepen pipelining on the dominant A stream when the reduction loop is
    # long enough; keep the default double-buffer otherwise (tiny grids).
    if n_pad // tk >= 3:
        a_spec = pl.BlockSpec((tm, tk), lambda i, k: (i, k),
                              pipeline_mode=pl.Buffered(3))
    else:
        a_spec = pl.BlockSpec((tm, tk), lambda i, k: (i, k))

    return pl.pallas_call(
        kernel,
        out_shape=jax.ShapeDtypeStruct((n_pad, h_pad), out_dtype),
        grid_spec=pltpu.PrefetchScalarGridSpec(
            num_scalar_prefetch=0,
            grid=(n_pad // tm, n_pad // tk),
            in_specs=[
                a_spec,                                             # A tile (i8)
                pl.BlockSpec((tk, c_pad), lambda i, k: (k, 0)),     # x (agg src)
                pl.BlockSpec((tm, c_pad), lambda i, k: (i, 0)),     # x (self)
                pl.BlockSpec((tm, 1), lambda i, k: (i, 0)),         # 1/deg rows
                pl.BlockSpec((c_pad, h_pad), lambda i, k: (0, 0)),  # W_l (bf16)
                pl.BlockSpec((c_pad, h_pad), lambda i, k: (0, 0)),  # W_r (bf16)
                pl.BlockSpec((1, h_pad), lambda i, k: (0, 0)),      # bias (f32)
            ],
            out_specs=pl.BlockSpec((tm, h_pad), lambda i, k: (i, 0)),
            scratch_shapes=[pltpu.VMEM((tm, c_pad), jnp.float32)],
        ),
        compiler_params=pltpu.CompilerParams(
            dimension_semantics=("parallel", "arbitrary"),
            vmem_limit_bytes=48 * 1024 * 1024),
    )(adj_i8, x_bf16, x_bf16, inv_deg, w_l, w_r, b)


def preprocess_graph(edge_index, num_nodes):
    """Build the padded int8 adjacency + f32 inverse degree ONCE (outside jit).

    For a static graph this runs once per graph, not per forward call, and the
    N^2 array never exists in f32.
    """
    n_pad, _, _ = _tiling(num_nodes)
    src, dst = edge_index[0], edge_index[1]
    counts = jnp.zeros((num_nodes, num_nodes), jnp.int32).at[dst, src].add(1)
    max_mult = int(jnp.max(counts))
    if max_mult > 127:
        raise ValueError("edge multiplicity > 127 overflows int8 adjacency")
    deg = jnp.sum(counts, axis=1, keepdims=True).astype(jnp.float32)
    inv_deg = 1.0 / jnp.maximum(deg, 1.0)       # isolated nodes aggregate to 0
    adj_p = jnp.pad(counts.astype(jnp.int8),
                    ((0, n_pad - num_nodes), (0, n_pad - num_nodes)))
    invd_p = jnp.pad(inv_deg, ((0, n_pad - num_nodes), (0, 0)),
                     constant_values=1.0)
    return adj_p, invd_p


def graphsage_forward(x, adj_p, invd_p, params):
    n, c_in = x.shape
    h_hid = params["w_l1"].shape[1]
    c_out = params["w_l2"].shape[1]

    n_pad, tm, tk = _tiling(n)
    assert adj_p.shape == (n_pad, n_pad), "adjacency padding mismatch"

    # Lane-dense padding: feature dims -> multiples of 128 (unmasked vst/vld,
    # no wasted MXU columns).
    lane = 128
    c_pad = _round_up(c_in, lane)
    h_pad = _round_up(h_hid, lane)
    o_pad = _round_up(c_out, lane)

    # Features and weights live in HBM as bf16 (halves the dominant re-streamed
    # x traffic and the resident weight footprint); bias stays f32 (added after
    # the f32-accumulating matmuls).
    x_p = _pad2(x, n_pad, c_pad).astype(jnp.bfloat16)
    wl1 = _pad2(params["w_l1"], c_pad, h_pad).astype(jnp.bfloat16)
    wr1 = _pad2(params["w_r1"], c_pad, h_pad).astype(jnp.bfloat16)
    b1 = _pad2(params["b1"].reshape(1, -1).astype(jnp.float32), 1, h_pad)
    wl2 = _pad2(params["w_l2"], h_pad, o_pad).astype(jnp.bfloat16)
    wr2 = _pad2(params["w_r2"], h_pad, o_pad).astype(jnp.bfloat16)
    b2 = _pad2(params["b2"].reshape(1, -1).astype(jnp.float32), 1, o_pad)

    # conv1 + ReLU; emitted as bf16 (padded hidden lanes stay exactly 0) and
    # fed straight to layer 2 without any re-cast.
    h = sage_layer(adj_p, invd_p, x_p, wl1, wr1, b1,
                   apply_relu=True, valid_out=h_hid, tm=tm, tk=tk,
                   out_dtype=jnp.bfloat16)
    # conv2 + log_softmax(dim=1) over the real output lanes, stored in f32.
    out_p = sage_layer(adj_p, invd_p, h, wl2, wr2, b2,
                       apply_log_softmax=True, valid_out=c_out, tm=tm, tk=tk,
                       out_dtype=jnp.float32)
    return out_p[:n, :c_out]


def _reference_forward(x, edge_index, params):
    """Pure-JAX f32 reference (PyG SAGEConv mean-aggregation semantics)."""
    n = x.shape[0]
    src, dst = edge_index[0], edge_index[1]
    adj = jnp.zeros((n, n), jnp.float32).at[dst, src].add(1.0)
    deg = jnp.maximum(jnp.sum(adj, axis=1, keepdims=True), 1.0)
    a = adj / deg
    h = jnp.maximum((a @ x) @ params["w_l1"] + params["b1"]
                    + x @ params["w_r1"], 0.0)
    o = (a @ h) @ params["w_l2"] + params["b2"] + h @ params["w_r2"]
    return jax.nn.log_softmax(o, axis=1)


def init_params(key, in_channels, hidden_channels, out_channels):
    k = jax.random.split(key, 6)
    s1 = 1.0 / jnp.sqrt(in_channels)
    s2 = 1.0 / jnp.sqrt(hidden_channels)
    return {
        # weights stored as (in, out) so the kernel does x @ W
        "w_l1": jax.random.uniform(k[0], (in_channels, hidden_channels),
                                   jnp.float32, -s1, s1),
        "w_r1": jax.random.uniform(k[1], (in_channels, hidden_channels),
                                   jnp.float32, -s1, s1),
        "b1": jax.random.uniform(k[2], (hidden_channels,), jnp.float32, -s1, s1),
        "w_l2": jax.random.uniform(k[3], (hidden_channels, out_channels),
                                   jnp.float32, -s2, s2),
        "w_r2": jax.random.uniform(k[4], (hidden_channels, out_channels),
                                   jnp.float32, -s2, s2),
        "b2": jax.random.uniform(k[5], (out_channels,), jnp.float32, -s2, s2),
    }


if __name__ == "__main__":
    key = jax.random.PRNGKey(0)
    k_x, k_e, k_p = jax.random.split(key, 3)

    N = 16                 # number of graph nodes
    in_channels = 8
    hidden_channels = 32
    out_channels = 8

    # Node features.
    x = jax.random.normal(k_x, (N, in_channels), jnp.float32)

    # Deterministic edge_index (2, E): directed ring (both ways) + random edges.
    ring_src = jnp.arange(N)
    ring_dst = (jnp.arange(N) + 1) % N
    rand_src = jax.random.randint(k_e, (16,), 0, N)
    rand_dst = jax.random.randint(jax.random.fold_in(k_e, 1), (16,), 0, N)
    edge_index = jnp.stack([
        jnp.concatenate([ring_src, ring_dst, rand_src]),
        jnp.concatenate([ring_dst, ring_src, rand_dst]),
    ], axis=0).astype(jnp.int32)

    params = init_params(k_p, in_channels, hidden_channels, out_channels)

    # Graph preprocessing (int8 adjacency + f32 inverse degree) runs ONCE,
    # outside the jitted forward.
    adj_p, invd_p = preprocess_graph(edge_index, N)

    fwd = jax.jit(graphsage_forward)
    out = jax.block_until_ready(fwd(x, adj_p, invd_p, params))
    ref = _reference_forward(x, edge_index, params)

    assert out.shape == (N, out_channels)
    assert bool(jnp.all(jnp.isfinite(out)))
    # rows of exp(log_softmax) must sum to ~1
    assert bool(jnp.allclose(jnp.sum(jnp.exp(out), axis=1), 1.0, atol=1e-3))
    # match the pure-f32 reference (tolerance covers the bf16 feature / weight
    # / intermediate-activation path)
    assert bool(jnp.allclose(out, ref, atol=8e-2, rtol=8e-2))

    print("KERNEL_OK")
</pallas_src>

<mosaic_0001>
module attributes {stable_mosaic.version = 11 : i64} {
  func.func @_sage_layer_kernel(%arg0: i32, %arg1: i32, %arg2: memref<128x128xi8, #tpu.memory_space<vmem>>, %arg3: memref<128x128xbf16, #tpu.memory_space<vmem>>, %arg4: memref<128x128xbf16, #tpu.memory_space<vmem>>, %arg5: memref<128x1xf32, #tpu.memory_space<vmem>>, %arg6: memref<128x128xbf16, #tpu.memory_space<vmem>>, %arg7: memref<128x128xbf16, #tpu.memory_space<vmem>>, %arg8: memref<1x128xf32, #tpu.memory_space<vmem>>, %arg9: memref<128x128xf32, #tpu.memory_space<vmem>>, %arg10: memref<128x128xf32, #tpu.memory_space<vmem>>) attributes {dimension_semantics = [#tpu.dimension_semantics<parallel>, #tpu.dimension_semantics<arbitrary>], iteration_bounds = array<i64: 1, 1>, scalar_prefetch = 0 : i64, scratch_operands = 1 : i64, tpu.core_type = #tpu.core_type<tc>, window_params = [{transform_indices = @transform_0, window_bounds = array<i64: 128, 128>}, {transform_indices = @transform_1, window_bounds = array<i64: 128, 128>}, {transform_indices = @transform_2, window_bounds = array<i64: 128, 128>}, {transform_indices = @transform_3, window_bounds = array<i64: 128, 1>}, {pipeline_mode = #tpu.pipeline_mode<synchronous>, transform_indices = @transform_4, window_bounds = array<i64: 128, 128>}, {pipeline_mode = #tpu.pipeline_mode<synchronous>, transform_indices = @transform_5, window_bounds = array<i64: 128, 128>}, {pipeline_mode = #tpu.pipeline_mode<synchronous>, transform_indices = @transform_6, window_bounds = array<i64: 1, 128>}, {transform_indices = @transform_7, window_bounds = array<i64: 128, 128>}]} {
    %c0_i32 = arith.constant 0 : i32
    %0 = arith.cmpi eq, %arg1, %c0_i32 : i32
    %1 = arith.extui %0 : i1 to i32
    %c0_i32_0 = arith.constant 0 : i32
    %2 = arith.cmpi ne, %1, %c0_i32_0 : i32
    scf.if %2 {
      %cst_10 = arith.constant 0.000000e+00 : f32
      %13 = vector.broadcast %cst_10 : f32 to vector<128x128xf32>
      %c0_11 = arith.constant 0 : index
      %c0_12 = arith.constant 0 : index
      %14 = vector.load %arg10[%c0_11, %c0_12] : memref<128x128xf32, #tpu.memory_space<vmem>>, vector<128x128xf32>
      tpu.vector_store %arg10[%c0_11, %c0_12], %13 {strides = array<i32>} : memref<128x128xf32, #tpu.memory_space<vmem>>, vector<128x128xf32>,
    } else {
    }
    %c0 = arith.constant 0 : index
    %c0_1 = arith.constant 0 : index
    %3 = vector.load %arg10[%c0, %c0_1] : memref<128x128xf32, #tpu.memory_space<vmem>>, vector<128x128xf32>
    %c0_2 = arith.constant 0 : index
    %c0_3 = arith.constant 0 : index
    %4 = vector.load %arg2[%c0_2, %c0_3] : memref<128x128xi8, #tpu.memory_space<vmem>>, vector<128x128xi8>
    %5 = arith.sitofp %4 : vector<128x128xi8> to vector<128x128xbf16>
    %c0_4 = arith.constant 0 : index
    %c0_5 = arith.constant 0 : index
    %6 = vector.load %arg3[%c0_4, %c0_5] : memref<128x128xbf16, #tpu.memory_space<vmem>>, vector<128x128xbf16>
    %cst = arith.constant dense<0.000000e+00> : vector<128x128xf32>
    %7 = tpu.matmul %5, %6, %cst {dimension_numbers = #tpu.dot_dimension_numbers<[1], [0], [0], [1], [0, 0, 1, 1], [], []>} : vector<128x128xbf16>, vector<128x128xbf16>, vector<128x128xf32> -> vector<128x128xf32>
    %8 = arith.addf %3, %7 : vector<128x128xf32>
    %c0_6 = arith.constant 0 : index
    %c0_7 = arith.constant 0 : index
    %9 = vector.load %arg10[%c0_6, %c0_7] : memref<128x128xf32, #tpu.memory_space<vmem>>, vector<128x128xf32>
    tpu.vector_store %arg10[%c0_6, %c0_7], %8 {strides = array<i32>} : memref<128x128xf32, #tpu.memory_space<vmem>>, vector<128x128xf32>,
    %c0_i32_8 = arith.constant 0 : i32
    %10 = arith.cmpi eq, %arg1, %c0_i32_8 : i32
    %11 = arith.extui %10 : i1 to i32
    %c0_i32_9 = arith.constant 0 : i32
    %12 = arith.cmpi ne, %11, %c0_i32_9 : i32
    scf.if %12 {
      %c0_10 = arith.constant 0 : index
      %c0_11 = arith.constant 0 : index
      %13 = vector.load %arg10[%c0_10, %c0_11] : memref<128x128xf32, #tpu.memory_space<vmem>>, vector<128x128xf32>
      %c0_12 = arith.constant 0 : index
      %c0_13 = arith.constant 0 : index
      %14 = vector.load %arg5[%c0_12, %c0_13] : memref<128x1xf32, #tpu.memory_space<vmem>>, vector<128x1xf32>
      %15 = vector.broadcast %14 : vector<128x1xf32> to vector<128x128xf32>
      %16 = arith.mulf %13, %15 : vector<128x128xf32>
      %17 = arith.truncf %16 : vector<128x128xf32> to vector<128x128xbf16>
      %c0_14 = arith.constant 0 : index
      %c0_15 = arith.constant 0 : index
      %18 = vector.load %arg6[%c0_14, %c0_15] : memref<128x128xbf16, #tpu.memory_space<vmem>>, vector<128x128xbf16>
      %cst_16 = arith.constant dense<0.000000e+00> : vector<128x128xf32>
      %19 = tpu.matmul %17, %18, %cst_16 {dimension_numbers = #tpu.dot_dimension_numbers<[1], [0], [0], [1], [0, 0, 1, 1], [], []>} : vector<128x128xbf16>, vector<128x128xbf16>, vector<128x128xf32> -> vector<128x128xf32>
      %c0_17 = arith.constant 0 : index
      %c0_18 = arith.constant 0 : index
      %20 = vector.load %arg4[%c0_17, %c0_18] : memref<128x128xbf16, #tpu.memory_space<vmem>>, vector<128x128xbf16>
      %c0_19 = arith.constant 0 : index
      %c0_20 = arith.constant 0 : index
      %21 = vector.load %arg7[%c0_19, %c0_20] : memref<128x128xbf16, #tpu.memory_space<vmem>>, vector<128x128xbf16>
      %cst_21 = arith.constant dense<0.000000e+00> : vector<128x128xf32>
      %22 = tpu.matmul %20, %21, %cst_21 {dimension_numbers = #tpu.dot_dimension_numbers<[1], [0], [0], [1], [0, 0, 1, 1], [], []>} : vector<128x128xbf16>, vector<128x128xbf16>, vector<128x128xf32> -> vector<128x128xf32>
      %23 = arith.addf %19, %22 : vector<128x128xf32>
      %c0_22 = arith.constant 0 : index
      %c0_23 = arith.constant 0 : index
      %24 = vector.load %arg8[%c0_22, %c0_23] : memref<1x128xf32, #tpu.memory_space<vmem>>, vector<1x128xf32>
      %25 = vector.broadcast %24 : vector<1x128xf32> to vector<128x128xf32>
      %26 = arith.addf %23, %25 : vector<128x128xf32>
      %27 = tpu.iota {dimensions = array<i32: 1>} : vector<128x128xi32>
      %c8_i32 = arith.constant 8 : i32
      %28 = vector.broadcast %c8_i32 : i32 to vector<128x128xi32>
      %29 = arith.cmpi slt, %27, %28 : vector<128x128xi32>
      %cst_24 = arith.constant 0xFF800000 : f32
      %30 = vector.broadcast %cst_24 : f32 to vector<128x128xf32>
      %31 = arith.select %29, %26, %30 : vector<128x128xi1>, vector<128x128xf32>
      %cst_25 = arith.constant dense<0xFF800000> : vector<128xf32>
      %32 = vector.multi_reduction <maximumf>, %31, %cst_25 [1] : vector<128x128xf32> to vector<128xf32>
      %33 = vector.shape_cast %32 : vector<128xf32> to vector<128x1xf32>
      %34 = vector.broadcast %33 : vector<128x1xf32> to vector<128x128xf32>
      %35 = arith.subf %26, %34 : vector<128x128xf32>
      %36 = math.exp %35 : vector<128x128xf32>
      %cst_26 = arith.constant 0.000000e+00 : f32
      %37 = vector.broadcast %cst_26 : f32 to vector<128x128xf32>
      %38 = arith.select %29, %36, %37 : vector<128x128xi1>, vector<128x128xf32>
      %cst_27 = arith.constant dense<0.000000e+00> : vector<128xf32>
      %39 = vector.multi_reduction <add>, %38, %cst_27 [1] : vector<128x128xf32> to vector<128xf32>
      %40 = vector.shape_cast %39 : vector<128xf32> to vector<128x1xf32>
      %41 = math.log %40 : vector<128x1xf32>
      %42 = vector.broadcast %41 : vector<128x1xf32> to vector<128x128xf32>
      %43 = arith.subf %35, %42 : vector<128x128xf32>
      %c0_28 = arith.constant 0 : index
      %c0_29 = arith.constant 0 : index
      %44 = vector.load %arg9[%c0_28, %c0_29] : memref<128x128xf32, #tpu.memory_space<vmem>>, vector<128x128xf32>
      tpu.vector_store %arg9[%c0_28, %c0_29], %43 {strides = array<i32>} : memref<128x128xf32, #tpu.memory_space<vmem>>, vector<128x128xf32>,
    } else {
    }
    return
  }
  func.func @transform_0(%arg0: i32, %arg1: i32) -> (i32, i32) {
    %c0_i32 = arith.constant 0 : i32
    return %arg0, %arg1 : i32, i32
  }
  func.func @transform_1(%arg0: i32, %arg1: i32) -> (i32, i32) {
    %c0_i32 = arith.constant 0 : i32
    %c0_i32_0 = arith.constant 0 : i32
    return %arg1, %c0_i32 : i32, i32
  }
  func.func @transform_2(%arg0: i32, %arg1: i32) -> (i32, i32) {
    %c0_i32 = arith.constant 0 : i32
    %c0_i32_0 = arith.constant 0 : i32
    return %arg0, %c0_i32 : i32, i32
  }
  func.func @transform_3(%arg0: i32, %arg1: i32) -> (i32, i32) {
    %c0_i32 = arith.constant 0 : i32
    %c0_i32_0 = arith.constant 0 : i32
    return %arg0, %c0_i32 : i32, i32
  }
  func.func @transform_4(%arg0: i32, %arg1: i32) -> (i32, i32) {
    %c0_i32 = arith.constant 0 : i32
    %c0_i32_0 = arith.constant 0 : i32
    %c0_i32_1 = arith.constant 0 : i32
    return %c0_i32, %c0_i32_0 : i32, i32
  }
  func.func @transform_5(%arg0: i32, %arg1: i32) -> (i32, i32) {
    %c0_i32 = arith.constant 0 : i32
    %c0_i32_0 = arith.constant 0 : i32
    %c0_i32_1 = arith.constant 0 : i32
    return %c0_i32, %c0_i32_0 : i32, i32
  }
  func.func @transform_6(%arg0: i32, %arg1: i32) -> (i32, i32) {
    %c0_i32 = arith.constant 0 : i32
    %c0_i32_0 = arith.constant 0 : i32
    %c0_i32_1 = arith.constant 0 : i32
    return %c0_i32, %c0_i32_0 : i32, i32
  }
  func.func @transform_7(%arg0: i32, %arg1: i32) -> (i32, i32) {
    %c0_i32 = arith.constant 0 : i32
    %c0_i32_0 = arith.constant 0 : i32
    return %arg0, %c0_i32 : i32, i32
  }
}

module attributes {stable_mosaic.version = 11 : i64} {
  func.func @_sage_layer_kernel(%arg0: i32, %arg1: i32, %arg2: memref<128x128xi8, #tpu.memory_space<vmem>>, %arg3: memref<128x128xbf16, #tpu.memory_space<vmem>>, %arg4: memref<128x128xbf16, #tpu.memory_space<vmem>>, %arg5: memref<128x1xf32, #tpu.memory_space<vmem>>, %arg6: memref<128x128xbf16, #tpu.memory_space<vmem>>, %arg7: memref<128x128xbf16, #tpu.memory_space<vmem>>, %arg8: memref<1x128xf32, #tpu.memory_space<vmem>>, %arg9: memref<128x128xbf16, #tpu.memory_space<vmem>>, %arg10: memref<128x128xf32, #tpu.memory_space<vmem>>) attributes {dimension_semantics = [#tpu.dimension_semantics<parallel>, #tpu.dimension_semantics<arbitrary>], iteration_bounds = array<i64: 1, 1>, scalar_prefetch = 0 : i64, scratch_operands = 1 : i64, tpu.core_type = #tpu.core_type<tc>, window_params = [{transform_indices = @transform_0, window_bounds = array<i64: 128, 128>}, {transform_indices = @transform_1, window_bounds = array<i64: 128, 128>}, {transform_indices = @transform_2, window_bounds = array<i64: 128, 128>}, {transform_indices = @transform_3, window_bounds = array<i64: 128, 1>}, {pipeline_mode = #tpu.pipeline_mode<synchronous>, transform_indices = @transform_4, window_bounds = array<i64: 128, 128>}, {pipeline_mode = #tpu.pipeline_mode<synchronous>, transform_indices = @transform_5, window_bounds = array<i64: 128, 128>}, {pipeline_mode = #tpu.pipeline_mode<synchronous>, transform_indices = @transform_6, window_bounds = array<i64: 1, 128>}, {transform_indices = @transform_7, window_bounds = array<i64: 128, 128>}]} {
    %c0_i32 = arith.constant 0 : i32
    %0 = arith.cmpi eq, %arg1, %c0_i32 : i32
    %1 = arith.extui %0 : i1 to i32
    %c0_i32_0 = arith.constant 0 : i32
    %2 = arith.cmpi ne, %1, %c0_i32_0 : i32
    scf.if %2 {
      %cst_10 = arith.constant 0.000000e+00 : f32
      %13 = vector.broadcast %cst_10 : f32 to vector<128x128xf32>
      %c0_11 = arith.constant 0 : index
      %c0_12 = arith.constant 0 : index
      %14 = vector.load %arg10[%c0_11, %c0_12] : memref<128x128xf32, #tpu.memory_space<vmem>>, vector<128x128xf32>
      tpu.vector_store %arg10[%c0_11, %c0_12], %13 {strides = array<i32>} : memref<128x128xf32, #tpu.memory_space<vmem>>, vector<128x128xf32>,
    } else {
    }
    %c0 = arith.constant 0 : index
    %c0_1 = arith.constant 0 : index
    %3 = vector.load %arg10[%c0, %c0_1] : memref<128x128xf32, #tpu.memory_space<vmem>>, vector<128x128xf32>
    %c0_2 = arith.constant 0 : index
    %c0_3 = arith.constant 0 : index
    %4 = vector.load %arg2[%c0_2, %c0_3] : memref<128x128xi8, #tpu.memory_space<vmem>>, vector<128x128xi8>
    %5 = arith.sitofp %4 : vector<128x128xi8> to vector<128x128xbf16>
    %c0_4 = arith.constant 0 : index
    %c0_5 = arith.constant 0 : index
    %6 = vector.load %arg3[%c0_4, %c0_5] : memref<128x128xbf16, #tpu.memory_space<vmem>>, vector<128x128xbf16>
    %cst = arith.constant dense<0.000000e+00> : vector<128x128xf32>
    %7 = tpu.matmul %5, %6, %cst {dimension_numbers = #tpu.dot_dimension_numbers<[1], [0], [0], [1], [0, 0, 1, 1], [], []>} : vector<128x128xbf16>, vector<128x128xbf16>, vector<128x128xf32> -> vector<128x128xf32>
    %8 = arith.addf %3, %7 : vector<128x128xf32>
    %c0_6 = arith.constant 0 : index
    %c0_7 = arith.constant 0 : index
    %9 = vector.load %arg10[%c0_6, %c0_7] : memref<128x128xf32, #tpu.memory_space<vmem>>, vector<128x128xf32>
    tpu.vector_store %arg10[%c0_6, %c0_7], %8 {strides = array<i32>} : memref<128x128xf32, #tpu.memory_space<vmem>>, vector<128x128xf32>,
    %c0_i32_8 = arith.constant 0 : i32
    %10 = arith.cmpi eq, %arg1, %c0_i32_8 : i32
    %11 = arith.extui %10 : i1 to i32
    %c0_i32_9 = arith.constant 0 : i32
    %12 = arith.cmpi ne, %11, %c0_i32_9 : i32
    scf.if %12 {
      %c0_10 = arith.constant 0 : index
      %c0_11 = arith.constant 0 : index
      %13 = vector.load %arg10[%c0_10, %c0_11] : memref<128x128xf32, #tpu.memory_space<vmem>>, vector<128x128xf32>
      %c0_12 = arith.constant 0 : index
      %c0_13 = arith.constant 0 : index
      %14 = vector.load %arg5[%c0_12, %c0_13] : memref<128x1xf32, #tpu.memory_space<vmem>>, vector<128x1xf32>
      %15 = vector.broadcast %14 : vector<128x1xf32> to vector<128x128xf32>
      %16 = arith.mulf %13, %15 : vector<128x128xf32>
      %17 = arith.truncf %16 : vector<128x128xf32> to vector<128x128xbf16>
      %c0_14 = arith.constant 0 : index
      %c0_15 = arith.constant 0 : index
      %18 = vector.load %arg6[%c0_14, %c0_15] : memref<128x128xbf16, #tpu.memory_space<vmem>>, vector<128x128xbf16>
      %cst_16 = arith.constant dense<0.000000e+00> : vector<128x128xf32>
      %19 = tpu.matmul %17, %18, %cst_16 {dimension_numbers = #tpu.dot_dimension_numbers<[1], [0], [0], [1], [0, 0, 1, 1], [], []>} : vector<128x128xbf16>, vector<128x128xbf16>, vector<128x128xf32> -> vector<128x128xf32>
      %c0_17 = arith.constant 0 : index
      %c0_18 = arith.constant 0 : index
      %20 = vector.load %arg4[%c0_17, %c0_18] : memref<128x128xbf16, #tpu.memory_space<vmem>>, vector<128x128xbf16>
      %c0_19 = arith.constant 0 : index
      %c0_20 = arith.constant 0 : index
      %21 = vector.load %arg7[%c0_19, %c0_20] : memref<128x128xbf16, #tpu.memory_space<vmem>>, vector<128x128xbf16>
      %cst_21 = arith.constant dense<0.000000e+00> : vector<128x128xf32>
      %22 = tpu.matmul %20, %21, %cst_21 {dimension_numbers = #tpu.dot_dimension_numbers<[1], [0], [0], [1], [0, 0, 1, 1], [], []>} : vector<128x128xbf16>, vector<128x128xbf16>, vector<128x128xf32> -> vector<128x128xf32>
      %23 = arith.addf %19, %22 : vector<128x128xf32>
      %c0_22 = arith.constant 0 : index
      %c0_23 = arith.constant 0 : index
      %24 = vector.load %arg8[%c0_22, %c0_23] : memref<1x128xf32, #tpu.memory_space<vmem>>, vector<1x128xf32>
      %25 = vector.broadcast %24 : vector<1x128xf32> to vector<128x128xf32>
      %26 = arith.addf %23, %25 : vector<128x128xf32>
      %cst_24 = arith.constant 0.000000e+00 : f32
      %27 = vector.broadcast %cst_24 : f32 to vector<128x128xf32>
      %28 = arith.maximumf %26, %27 : vector<128x128xf32>
      %29 = arith.truncf %28 : vector<128x128xf32> to vector<128x128xbf16>
      %c0_25 = arith.constant 0 : index
      %c0_26 = arith.constant 0 : index
      %30 = vector.load %arg9[%c0_25, %c0_26] : memref<128x128xbf16, #tpu.memory_space<vmem>>, vector<128x128xbf16>
      tpu.vector_store %arg9[%c0_25, %c0_26], %29 {strides = array<i32>} : memref<128x128xbf16, #tpu.memory_space<vmem>>, vector<128x128xbf16>,
    } else {
    }
    return
  }
  func.func @transform_0(%arg0: i32, %arg1: i32) -> (i32, i32) {
    %c0_i32 = arith.constant 0 : i32
    return %arg0, %arg1 : i32, i32
  }
  func.func @transform_1(%arg0: i32, %arg1: i32) -> (i32, i32) {
    %c0_i32 = arith.constant 0 : i32
    %c0_i32_0 = arith.constant 0 : i32
    return %arg1, %c0_i32 : i32, i32
  }
  func.func @transform_2(%arg0: i32, %arg1: i32) -> (i32, i32) {
    %c0_i32 = arith.constant 0 : i32
    %c0_i32_0 = arith.constant 0 : i32
    return %arg0, %c0_i32 : i32, i32
  }
  func.func @transform_3(%arg0: i32, %arg1: i32) -> (i32, i32) {
    %c0_i32 = arith.constant 0 : i32
    %c0_i32_0 = arith.constant 0 : i32
    return %arg0, %c0_i32 : i32, i32
  }
  func.func @transform_4(%arg0: i32, %arg1: i32) -> (i32, i32) {
    %c0_i32 = arith.constant 0 : i32
    %c0_i32_0 = arith.constant 0 : i32
    %c0_i32_1 = arith.constant 0 : i32
    return %c0_i32, %c0_i32_0 : i32, i32
  }
  func.func @transform_5(%arg0: i32, %arg1: i32) -> (i32, i32) {
    %c0_i32 = arith.constant 0 : i32
    %c0_i32_0 = arith.constant 0 : i32
    %c0_i32_1 = arith.constant 0 : i32
    return %c0_i32, %c0_i32_0 : i32, i32
  }
  func.func @transform_6(%arg0: i32, %arg1: i32) -> (i32, i32) {
    %c0_i32 = arith.constant 0 : i32
    %c0_i32_0 = arith.constant 0 : i32
    %c0_i32_1 = arith.constant 0 : i32
    return %c0_i32, %c0_i32_0 : i32, i32
  }
  func.func @transform_7(%arg0: i32, %arg1: i32) -> (i32, i32) {
    %c0_i32 = arith.constant 0 : i32
    %c0_i32_0 = arith.constant 0 : i32
    return %arg0, %c0_i32 : i32, i32
  }
}

</mosaic_0001>

<bundles_post_ra>
// kernel: graphsage_forward.3
= control target key start
LH: loop header
LB: loop body
LE: loop exit
PB: predicated region body
PF: predicated region fallthrough
CT: control target
= control target key end

     0   :  { %v1339_v1 = vmov 0   ;;  %s1806_s1 = inlined_call_operand.vmem [shape: bf16[128,128], index: 1, kind: input, shape index: {}, may-alias: {1,2}]   ;;  %s1807_s0 = inlined_call_operand.vmem [shape: s8[128,128], index: 0, kind: input, shape index: {}]   ;;  %s1808_s3 = inlined_call_operand.vmem [shape: f32[128,1], index: 3, kind: input, shape index: {}]   ;;  %s1809_s5 = inlined_call_operand.vmem [shape: bf16[128,128], index: 5, kind: input, shape index: {}]   ;;  %s1810_s4 = inlined_call_operand.vmem [shape: bf16[128,128], index: 4, kind: input, shape index: {}]   ;;  %s1811_s2 = inlined_call_operand.vmem [shape: bf16[128,128], index: 2, kind: input, shape index: {}, may-alias: {1,2}]   ;;  %s1812_s6 = inlined_call_operand.vmem [shape: f32[1,128], index: 6, kind: input, shape index: {}]   ;;  %s1813_s7 = inlined_call_operand.vmem [shape: f32[128,128], index: 7, kind: output, shape index: {}]  }
   0x1   :  { %v1243_v0 = vld [vmem:[%s1806_s1] sm:$0xff]   ;;  %1242 = vset.pattern.permute.xlu1 %v1339_v1  ;;  %1241 = vset.pattern.permute.xlu0 %v1339_v1  ;;  %v1244_v2 = vld [vmem:[%s1806_s1 + $0x8] sm:$0xff]   ;;  %v1245_v3 = vld [vmem:[%s1806_s1 + $0x10] sm:$0xff]  }
   0x2   :  { %1112 = vmatprep.subr.bf16.mxu0 %v1243_v0  ;;  %v1246_v4 = vld [vmem:[%s1806_s1 + $0x18] sm:$0xff]   ;;  %v1395_v5 = vld [vmem:[%s1807_s0] sm:$0xff]  ;;  %v289_v7 = vld [vmem:[%s1808_s3 + $0x10] sm:$0xff] }
   0x3   :  { %1113 = vmatpush3.bf16.msra.mxu0 %v1243_v0  ;;  %v67_v6 = vunpack.c.l.s8.bf16 %v1395_v5  ;;  %v287_v8 = vld [vmem:[%s1808_s3] sm:$0xff]  ;;  %315 = vperm.xlu1 %1242, %v289_v7   ;;  %v290_v9 = vld [vmem:[%s1808_s3 + $0x18] sm:$0xff]  ;;  %v288_v10 = vld [vmem:[%s1808_s3 + $0x8] sm:$0xff]  ;;  %v68_v31 = vunpack.c.h.s8.bf16 %v1395_v5 }
   0x4   :  { %1114 = vmatprep.subr.bf16.mxu0 %v1244_v2  ;;  %305 = vperm.xlu0 %1241, %v287_v8   ;;  %v1247_v11 = vld [vmem:[%s1806_s1 + $0x20] sm:$0xff]   ;;  %v1248_v12 = vld [vmem:[%s1806_s1 + $0x28] sm:$0xff]   ;;  %v1249_v17 = vld [vmem:[%s1806_s1 + $0x30] sm:$0xff]  }
   0x5   :  { %1128 = vmatprep.mubr.bf16.mxu0 %v67_v6  ;;  %v296_v13 = vld [vmem:[%s1808_s3 + $0x48] sm:$0xff]  ;;  %v295_v14 = vld [vmem:[%s1808_s3 + $0x40] sm:$0xff]  ;;  %v298_v18 = vld [vmem:[%s1808_s3 + $0x58] sm:$0xff] }
   0x6   :  { %v1251_v15 = vld [vmem:[%s1809_s5] sm:$0xff]   ;;  %v1252_v16 = vld [vmem:[%s1809_s5 + $0x8] sm:$0xff]   ;;  %v297_v19 = vld [vmem:[%s1808_s3 + $0x50] sm:$0xff] }
   0x7   :  { %1115 = vmatpush3.bf16.msra.mxu0 %v1244_v2  ;;  %320 = vperm.xlu1 %1242, %v290_v9   ;;  %v1253_v20 = vld [vmem:[%s1809_s5 + $0x10] sm:$0xff]   ;;  %v1250_v21 = vld [vmem:[%s1806_s1 + $0x38] sm:$0xff]   ;;  %v292_v22 = vld [vmem:[%s1808_s3 + $0x28] sm:$0xff] }
   0x8   :  { %1116 = vmatprep.subr.bf16.mxu0 %v1245_v3  ;;  %310 = vperm.xlu0 %1241, %v288_v10   ;;  %v291_v23 = vld [vmem:[%s1808_s3 + $0x20] sm:$0xff]  ;;  %v1254_v24 = vld [vmem:[%s1809_s5 + $0x18] sm:$0xff]   ;;  %v293_v26 = vld [vmem:[%s1808_s3 + $0x30] sm:$0xff] }
   0x9   :  { %1144 = vmatprep.subr.bf16.mxu1 %v1251_v15  ;;  %v294_v25 = vld [vmem:[%s1808_s3 + $0x38] sm:$0xff]  ;;  %v64_v27 = vld [vmem:[%s1807_s0 + $0x8] sm:$0xff]  ;;  %v1464_v28 = vld [vmem:[%s1810_s4] sm:$0xff]  }
   0xa   :  { %1145 = vmatpush3.bf16.msra.mxu1 %v1251_v15  ;;  %v1256_v29 = vld [vmem:[%s1809_s5 + $0x20] sm:$0xff]   ;;  %v300_v30 = vld [vmem:[%s1808_s3 + $0x68] sm:$0xff]  ;;  %v69_v34 = vunpack.c.l.s8.bf16 %v64_v27  ;;  %v302_v37 = vld [vmem:[%s1808_s3 + $0x78] sm:$0xff]  ;;  %v70_v42 = vunpack.c.h.s8.bf16 %v64_v27 }
   0xb   :  { %1117 = vmatpush3.bf16.msra.mxu0 %v1245_v3  ;;  %350 = vperm.xlu1 %1242, %v296_v13   ;;  %v299_v32 = vld [vmem:[%s1808_s3 + $0x60] sm:$0xff]  ;;  %v1257_v35 = vld [vmem:[%s1810_s4 + $0x8] sm:$0xff]   ;;  %v65_v38 = vld [vmem:[%s1807_s0 + $0x10] sm:$0xff] }
   0xc   :  { %1118 = vmatprep.subr.bf16.mxu0 %v1246_v4  ;;  %345 = vperm.xlu0 %1241, %v295_v14   ;;  %v1263_v33 = vld [vmem:[%s1811_s2] sm:$0xff]   ;;  %v1258_v36 = vld [vmem:[%s1809_s5 + $0x28] sm:$0xff]   ;;  %v301_v39 = vld [vmem:[%s1808_s3 + $0x70] sm:$0xff]  ;;  %v71_v43 = vunpack.c.l.s8.bf16 %v65_v38  ;;  %v72_v48 = vunpack.c.h.s8.bf16 %v65_v38 }
   0xd   :  { %1146 = vmatprep.subr.bf16.mxu1 %v1252_v16  ;;  %1160 = vmatprep.mubr.bf16.mxu1 %v1263_v33  ;;  %v1259_v40 = vld [vmem:[%s1810_s4 + $0x10] sm:$0xff]   ;;  %v1261_v44 = vld [vmem:[%s1810_s4 + $0x18] sm:$0xff]   ;;  %v1264_v47 = vld [vmem:[%s1810_s4 + $0x20] sm:$0xff]  }
   0xe   :  { %1147 = vmatpush3.bf16.msra.mxu1 %v1252_v16  ;;  %v1260_v41 = vld [vmem:[%s1809_s5 + $0x30] sm:$0xff]   ;;  %v1262_v45 = vld [vmem:[%s1809_s5 + $0x38] sm:$0xff]   ;;  %v1265_v50 = vld [vmem:[%s1811_s2 + $0x8] sm:$0xff]  }
   0xf   :  { %1119 = vmatpush3.bf16.msra.mxu0 %v1246_v4  ;;  %360 = vperm.xlu1 %1242, %v298_v18   ;;  %v66_v46 = vld [vmem:[%s1807_s0 + $0x18] sm:$0xff]  ;;  %v1266_v51 = vld [vmem:[%s1810_s4 + $0x28] sm:$0xff]   ;;  %v1267_v53 = vld [vmem:[%s1811_s2 + $0x10] sm:$0xff]  }
  0x10   :  { %1120 = vmatprep.subr.bf16.mxu0 %v1247_v11  ;;  %355 = vperm.xlu0 %1241, %v297_v19   ;;  %v73_v49 = vunpack.c.l.s8.bf16 %v66_v46  ;;  %v74_v52 = vunpack.c.h.s8.bf16 %v66_v46  ;;  %v1268_v54 = vld [vmem:[%s1810_s4 + $0x30] sm:$0xff]   ;;  %v1269_v55 = vld [vmem:[%s1811_s2 + $0x18] sm:$0xff]   ;;  %v1271_v57 = vld [vmem:[%s1811_s2 + $0x20] sm:$0xff]  }
  0x11   :  { %1148 = vmatprep.subr.bf16.mxu1 %v1253_v20  ;;  %v1270_v56 = vld [vmem:[%s1810_s4 + $0x38] sm:$0xff]   ;;  %v1272_v58 = vld [vmem:[%s1811_s2 + $0x28] sm:$0xff]   ;;  %v1273_v59 = vld [vmem:[%s1811_s2 + $0x30] sm:$0xff]  }
  0x12   :  { %1149 = vmatpush3.bf16.msra.mxu1 %v1253_v20  ;;  %v1274_v60 = vld [vmem:[%s1811_s2 + $0x38] sm:$0xff]  }
  0x13   :  { %1121 = vmatpush3.bf16.msra.mxu0 %v1247_v11  ;;  %330 = vperm.xlu1 %1242, %v292_v22  }
  0x14   :  { %1122 = vmatprep.subr.bf16.mxu0 %v1248_v12  ;;  %325 = vperm.xlu0 %1241, %v291_v23  }
  0x15   :  { %1150 = vmatprep.subr.bf16.mxu1 %v1254_v24 }
  0x16   :  { %1151 = vmatpush3.bf16.msra.mxu1 %v1254_v24 }
  0x17   :  { %1123 = vmatpush3.bf16.msra.mxu0 %v1248_v12  ;;  %340 = vperm.xlu1 %1242, %v294_v25  }
  0x18   :  { %1124 = vmatprep.subr.bf16.mxu0 %v1249_v17  ;;  %335 = vperm.xlu0 %1241, %v293_v26  }
  0x19   :  { %1152 = vmatprep.subr.bf16.mxu1 %v1256_v29 }
  0x1a   :  { %1153 = vmatpush3.bf16.msra.mxu1 %v1256_v29 }
  0x1b   :  { %1125 = vmatpush3.bf16.msra.mxu0 %v1249_v17  ;;  %370 = vperm.xlu1 %1242, %v300_v30  }
  0x1c   :  { %1126 = vmatprep.subr.bf16.mxu0 %v1250_v21  ;;  %365 = vperm.xlu0 %1241, %v299_v32  }
  0x1d   :  { %1154 = vmatprep.subr.bf16.mxu1 %v1258_v36 }
  0x1e   :  { %1155 = vmatpush3.bf16.msra.mxu1 %v1258_v36 }
  0x1f   :  { %1127 = vmatpush3.bf16.msra.mxu0 %v1250_v21  ;;  %380 = vperm.xlu1 %1242, %v302_v37  }
  0x20   :  { %1176 = vmatprep.subr.bf16.mxu0 %v1464_v28  ;;  %375 = vperm.xlu0 %1241, %v301_v39  }
  0x21   :  { %1156 = vmatprep.subr.bf16.mxu1 %v1260_v41 }
  0x22   :  { %1129 = vmatmul.mubr.bf16.vlgmr.msra.gmra.mrb[0].mxu0 %v68_v31  ;;  %1157 = vmatpush3.bf16.msra.mxu1 %v1260_v41 }
  0x23   :  { %1132 = vmatprep.mubr.bf16.mxu0 %v69_v34  ;;  %1177 = vmatpush3.bf16.msra.mxu0 %v1464_v28 }
  0x24   :  { %1178 = vmatprep.subr.bf16.mxu0 %v1257_v35  ;;  %1158 = vmatprep.subr.bf16.mxu1 %v1262_v45 }
  0x26   :  { %1159 = vmatpush3.bf16.msra.mxu1 %v1262_v45 }
  0x27   :  { %1179 = vmatpush3.bf16.msra.mxu0 %v1257_v35  ;;  %1208 = vmatprep.subr.bf16.mxu1 %v1464_v28 }
  0x28   :  { %1180 = vmatprep.subr.bf16.mxu0 %v1259_v40 }
  0x29   :  { %1161 = vmatmul.mubr.bf16.vlgmr.msra.gmra.mrb[0].mxu1 %v1265_v50 }
  0x2a   :  { %1133 = vmatmul.mubr.bf16.gmra.mrb[4].mxu0 %v70_v42  ;;  %1216 = vmatpush3.bf16.msra.mxu1 %v1464_v28 }
  0x2b   :  { %1136 = vmatprep.mubr.bf16.mxu0 %v71_v43  ;;  %1181 = vmatpush3.bf16.msra.mxu0 %v1259_v40 }
  0x2c   :  { %1182 = vmatprep.subr.bf16.mxu0 %v1261_v44  ;;  %1209 = vmatprep.subr.bf16.mxu1 %v1257_v35 }
  0x2d   :  { %1164 = vmatprep.mubr.bf16.mxu1 %v1267_v53 }
  0x2e   :  { %1217 = vmatpush3.bf16.msra.mxu1 %v1257_v35 }
  0x2f   :  { %1183 = vmatpush3.bf16.msra.mxu0 %v1261_v44  ;;  %1210 = vmatprep.subr.bf16.mxu1 %v1259_v40 }
  0x30   :  { %1184 = vmatprep.subr.bf16.mxu0 %v1264_v47 }
  0x31   :  { %1165 = vmatmul.mubr.bf16.gmra.mrb[4].mxu1 %v1269_v55 }
  0x32   :  { %1137 = vmatmul.mubr.bf16.gmra.mrb[8].mxu0 %v72_v48  ;;  %1218 = vmatpush3.bf16.msra.mxu1 %v1259_v40 }
  0x33   :  { %1140 = vmatprep.mubr.bf16.mxu0 %v73_v49  ;;  %1185 = vmatpush3.bf16.msra.mxu0 %v1264_v47 }
  0x34   :  { %1186 = vmatprep.subr.bf16.mxu0 %v1266_v51  ;;  %1211 = vmatprep.subr.bf16.mxu1 %v1261_v44 }
  0x35   :  { %1168 = vmatprep.mubr.bf16.mxu1 %v1271_v57 }
  0x36   :  { %1219 = vmatpush3.bf16.msra.mxu1 %v1261_v44 }
  0x37   :  { %1187 = vmatpush3.bf16.msra.mxu0 %v1266_v51  ;;  %1212 = vmatprep.subr.bf16.mxu1 %v1264_v47 }
  0x38   :  { %1188 = vmatprep.subr.bf16.mxu0 %v1268_v54 }
  0x39   :  { %1169 = vmatmul.mubr.bf16.gmra.mrb[8].mxu1 %v1272_v58 }
  0x3a   :  { %1141 = vmatmul.mubr.bf16.gmra.mrb[12].mxu0 %v74_v52  ;;  %1220 = vmatpush3.bf16.msra.mxu1 %v1264_v47 }
  0x3b   :  { %1213 = vmatprep.subr.bf16.mxu1 %v1266_v51  ;;  %1189 = vmatpush3.bf16.msra.mxu0 %v1268_v54 }
  0x3c   :  { %1190 = vmatprep.subr.bf16.mxu0 %v1270_v56  ;;  %1172 = vmatprep.mubr.bf16.mxu1 %v1273_v59 }
  0x3e   :  { %1221 = vmatpush3.bf16.msra.mxu1 %v1266_v51 }
  0x3f   :  { %1214 = vmatprep.subr.bf16.mxu1 %v1268_v54  ;;  %1191 = vmatpush3.bf16.msra.mxu0 %v1270_v56 }
  0x41   :  { %1173 = vmatmul.mubr.bf16.gmra.mrb[12].mxu1 %v1274_v60 }
  0x42   :  { %1222 = vmatpush3.bf16.msra.mxu1 %v1268_v54 }
  0x43   :  { %1215 = vmatprep.subr.bf16.mxu1 %v1270_v56 }
  0x46   :  { %1223 = vmatpush3.bf16.msra.mxu1 %v1270_v56 }
  0x82   :  { %v316_v61 = vpop.permute.xlu1 %315 }
  0x83   :  { %v306_v62 = vpop.permute.xlu0 %305 }
  0x86   :  { %v321_v63 = vpop.permute.xlu1 %320 }
  0x87   :  { %v311_v0 = vpop.permute.xlu0 %310 }
  0x8a   :  { %v351_v1 = vpop.permute.xlu1 %350 }
  0x8b   :  { %v346_v2 = vpop.permute.xlu0 %345 }
  0x8e   :  { %v361_v3 = vpop.permute.xlu1 %360 }
  0x8f   :  { %v356_v4 = vpop.permute.xlu0 %355 }
  0x92   :  { %v331_v8 = vpop.permute.xlu1 %330 }
  0x93   :  { %v326_v12 = vpop.permute.xlu0 %325 }
  0x96   :  { %v341_v18 = vpop.permute.xlu1 %340 }
  0x97   :  { %v336_v20 = vpop.permute.xlu0 %335 }
  0x9a   :  { %v371_v29 = vpop.permute.xlu1 %370 }
  0x9b   :  { %v366_v39 = vpop.permute.xlu0 %365 }
  0x9e   :  { %v381_v46 = vpop.permute.xlu1 %380 }
  0x9f   :  { %v376_v48 = vpop.permute.xlu0 %375 }
  0xf5   :  { %v1130_v5 = vpop.f32.mrb[0].mxu0 }
  0xf6   :  { %v173_v6 = vpop.f32.mrb[1].mxu0  ;;  %v385_v9 = vmul.f32 %v1130_v5, %v316_v61  ;;  %v816_v61 = vlaneseq }
  0xf7   :  { %v1131_v7 = vpop.f32.mrb[2].mxu0  ;;  %v383_v13 = vmul.f32 %v306_v62, %v173_v6 }
  0xf8   :  { %v386_v10 = vmul.f32 %v1131_v7, %v321_v63  ;;  %v176_v11 = vpop.f32.mrb[3].mxu0  ;;  %v1546_v62 = vand.u32 127, %v816_v61 }
  0xf9   :  { %v384_v14 = vmul.f32 %v311_v0, %v176_v11  ;;  %v1551_v0 = vld [vmem:[%s1812_s6] ss:$0 sm:$0xff] }
  0xfa   :  { %v400_v15 = vpack.c.bf16 %v386_v10, %v385_v9  ;;  %vm818_vm0 = vcmp.lt.s32.totalorder %v1546_v62, 8 }
  0xfb   :  { %v399_v16 = vpack.c.bf16 %v384_v14, %v383_v13 }
  0xfc   :  { %v1162_v32 = vpop.f32.mrb[0].mxu1 }
  0xfd   :  { %v1134_v17 = vpop.f32.mrb[4].mxu0  ;;  %1192 = vmatprep.mubr.bf16.mxu0 %v399_v16  ;;  %v585_v34 = vpop.f32.mrb[1].mxu1 }
  0xfe   :  { %v189_v19 = vpop.f32.mrb[5].mxu0  ;;  %1193 = vmatmul.mubr.bf16.vlgmr.msra.gmra.mrb[16].mxu0 %v400_v15  ;;  %v389_v22 = vmul.f32 %v1134_v17, %v336_v20  ;;  %v1163_v38 = vpop.f32.mrb[2].mxu1 }
  0xff   :  { %v1135_v21 = vpop.f32.mrb[6].mxu0  ;;  %v387_v25 = vmul.f32 %v326_v12, %v189_v19  ;;  %v588_v42 = vpop.f32.mrb[3].mxu1 }
 0x100   :  { %v390_v23 = vmul.f32 %v1135_v21, %v341_v18  ;;  %v192_v24 = vpop.f32.mrb[7].mxu0 }
 0x101   :  { %v388_v26 = vmul.f32 %v331_v8, %v192_v24 }
 0x102   :  { %v402_v27 = vpack.c.bf16 %v390_v23, %v389_v22 }
 0x103   :  { %v401_v28 = vpack.c.bf16 %v388_v26, %v387_v25 }
 0x104   :  { %v1166_v57 = vpop.f32.mrb[4].mxu1 }
 0x105   :  { %v1138_v30 = vpop.f32.mrb[8].mxu0  ;;  %1196 = vmatprep.mubr.bf16.mxu0 %v401_v28  ;;  %v601_v58 = vpop.f32.mrb[5].mxu1 }
 0x106   :  { %v205_v31 = vpop.f32.mrb[9].mxu0  ;;  %1197 = vmatmul.mubr.bf16.gmra.mrb[20].mxu0 %v402_v27  ;;  %v393_v35 = vmul.f32 %v1138_v30, %v356_v4  ;;  %v1167_v59 = vpop.f32.mrb[6].mxu1 }
 0x107   :  { %v1139_v33 = vpop.f32.mrb[10].mxu0  ;;  %v391_v40 = vmul.f32 %v346_v2, %v205_v31  ;;  %v604_v60 = vpop.f32.mrb[7].mxu1 }
 0x108   :  { %v394_v36 = vmul.f32 %v1139_v33, %v361_v3  ;;  %v208_v37 = vpop.f32.mrb[11].mxu0 }
 0x109   :  { %v392_v41 = vmul.f32 %v351_v1, %v208_v37 }
 0x10a   :  { %v404_v43 = vpack.c.bf16 %v394_v36, %v393_v35 }
 0x10b   :  { %v403_v44 = vpack.c.bf16 %v392_v41, %v391_v40 }
 0x10d   :  { %v1142_v45 = vpop.f32.mrb[12].mxu0  ;;  %1200 = vmatprep.mubr.bf16.mxu1 %v403_v44 }
 0x10e   :  { %v221_v47 = vpop.f32.mrb[13].mxu0  ;;  %1201 = vmatmul.mubr.bf16.vlgmr.msra.gmra.mrb[8].mxu1 %v404_v43  ;;  %v397_v50 = vmul.f32 %v1142_v45, %v376_v48 }
 0x10f   :  { %v1143_v49 = vpop.f32.mrb[14].mxu0  ;;  %v395_v53 = vmul.f32 %v366_v39, %v221_v47 }
 0x110   :  { %v398_v51 = vmul.f32 %v1143_v49, %v381_v46  ;;  %v224_v52 = vpop.f32.mrb[15].mxu0 }
 0x111   :  { %v396_v54 = vmul.f32 %v371_v29, %v224_v52 }
 0x112   :  { %v406_v55 = vpack.c.bf16 %v398_v51, %v397_v50 }
 0x113   :  { %v405_v56 = vpack.c.bf16 %v396_v54, %v395_v53 }
 0x115   :  { %1204 = vmatprep.mubr.bf16.mxu1 %v405_v56 }
 0x116   :  { %1205 = vmatmul.mubr.bf16.gmra.mrb[12].mxu1 %v406_v55 }
 0x1d1   :  { %v1194_v63 = vpop.f32.mrb[16].mxu0 }
 0x1d2   :  { %v739_v1 = vadd.f32 %v1194_v63, %v1162_v32  ;;  %v730_v2 = vpop.f32.mrb[17].mxu0 }
 0x1d3   :  { %v731_v3 = vadd.f32 %v730_v2, %v585_v34  ;;  %v1195_v4 = vpop.f32.mrb[18].mxu0 }
 0x1d4   :  { %v742_v5 = vadd.f32 %v1195_v4, %v1163_v38  ;;  %v733_v6 = vpop.f32.mrb[19].mxu0  ;;  %v1555_v7 = vadd.f32 %v1551_v0, %v739_v1 }
 0x1d5   :  { %v734_v8 = vadd.f32 %v733_v6, %v588_v42  ;;  %v1561_v10 = vadd.f32 %v1551_v0, %v731_v3 }
 0x1d6   :  { %v821_v9 = vsel %vm818_vm0, %v1555_v7, -inf  ;;  %v1573_v17 = vadd.f32 %v1551_v0, %v742_v5 }
 0x1d7   :  { %839 = vmax.xlane.f32.xlu0 %v821_v9  ;;  %v1564_v11 = vadd.f32 %v1551_v0, %v734_v8  ;;  %v819_v16 = vsel %vm818_vm0, %v1561_v10, -inf }
 0x1d8   :  { %v822_v25 = vsel %vm818_vm0, %v1573_v17, -inf }
 0x1d9   :  { %v1198_v12 = vpop.f32.mrb[20].mxu0  ;;  %v820_v13 = vsel %vm818_vm0, %v1564_v11, -inf }
 0x1da   :  { %v755_v14 = vadd.f32 %v1198_v12, %v1166_v57  ;;  %v746_v15 = vpop.f32.mrb[21].mxu0  ;;  %837 = vmax.xlane.f32.xlu1 %v820_v13 }
 0x1db   :  { %v747_v18 = vadd.f32 %v746_v15, %v601_v58  ;;  %v1199_v19 = vpop.f32.mrb[22].mxu0  ;;  %835 = vmax.xlane.f32.xlu0 %v819_v16 }
 0x1dc   :  { %v758_v20 = vadd.f32 %v1199_v19, %v1167_v59  ;;  %v749_v21 = vpop.f32.mrb[23].mxu0  ;;  %v806_v22 = vadd.f32 %v1551_v0, %v755_v14 }
 0x1dd   :  { %v750_v23 = vadd.f32 %v749_v21, %v604_v60  ;;  %v1582_v26 = vadd.f32 %v1551_v0, %v747_v18 }
 0x1de   :  { %v825_v24 = vsel %vm818_vm0, %v806_v22, -inf  ;;  %v1585_v27 = vadd.f32 %v1551_v0, %v758_v20 }
 0x1df   :  { %847 = vmax.xlane.f32.xlu1 %v825_v24  ;;  %841 = vmax.xlane.f32.xlu0 %v822_v25  ;;  %v823_v31 = vsel %vm818_vm0, %v1582_v26, -inf  ;;  %v1597_v33 = vadd.f32 %v1551_v0, %v750_v23 }
 0x1e0   :  { %v826_v32 = vsel %vm818_vm0, %v1585_v27, -inf }
 0x1e1   :  { %v1202_v28 = vpop.f32.mrb[8].mxu1  ;;  %v824_v39 = vsel %vm818_vm0, %v1597_v33, -inf }
 0x1e2   :  { %v1588_v29 = vadd.f32 %v1202_v28, %v1551_v0  ;;  %v762_v30 = vpop.f32.mrb[9].mxu1 }
 0x1e3   :  { %v1203_v34 = vpop.f32.mrb[10].mxu1  ;;  %843 = vmax.xlane.f32.xlu1 %v823_v31  ;;  %849 = vmax.xlane.f32.xlu0 %v826_v32  ;;  %v1600_v36 = vadd.f32 %v1551_v0, %v762_v30 }
 0x1e4   :  { %v765_v35 = vpop.f32.mrb[11].mxu1  ;;  %v1603_v37 = vadd.f32 %v1203_v34, %v1551_v0  ;;  %v829_v38 = vsel %vm818_vm0, %v1588_v29, -inf }
 0x1e5   :  { %v1612_v41 = vadd.f32 %v1551_v0, %v765_v35  ;;  %v827_v43 = vsel %vm818_vm0, %v1600_v36, -inf }
 0x1e6   :  { %v830_v44 = vsel %vm818_vm0, %v1603_v37, -inf }
 0x1e7   :  { %855 = vmax.xlane.f32.xlu1 %v829_v38  ;;  %845 = vmax.xlane.f32.xlu0 %v824_v39  ;;  %v828_v51 = vsel %vm818_vm0, %v1612_v41, -inf }
 0x1e9   :  { %v1206_v40 = vpop.f32.mrb[12].mxu1 }
 0x1ea   :  { %v778_v42 = vpop.f32.mrb[13].mxu1  ;;  %v1627_v49 = vadd.f32 %v1206_v40, %v1551_v0 }
 0x1eb   :  { %v1621_v45 = vadd.f32 %v1551_v0, %v778_v42  ;;  %851 = vmax.xlane.f32.xlu1 %v827_v43  ;;  %857 = vmax.xlane.f32.xlu0 %v830_v44  ;;  %v1207_v46 = vpop.f32.mrb[14].mxu1 }
 0x1ec   :  { %v781_v47 = vpop.f32.mrb[15].mxu1  ;;  %v1636_v52 = vadd.f32 %v1207_v46, %v1551_v0  ;;  %v833_v53 = vsel %vm818_vm0, %v1627_v49, -inf }
 0x1ed   :  { %v831_v48 = vsel %vm818_vm0, %v1621_v45, -inf  ;;  %v1630_v50 = vadd.f32 %v1551_v0, %v781_v47 }
 0x1ee   :  { %v834_v55 = vsel %vm818_vm0, %v1636_v52, -inf }
 0x1ef   :  { %853 = vmax.xlane.f32.xlu0 %v828_v51  ;;  %859 = vmax.xlane.f32.xlu1 %v831_v48  ;;  %v832_v54 = vsel %vm818_vm0, %v1630_v50, -inf }
 0x1f3   :  { %863 = vmax.xlane.f32.xlu1 %v833_v53  ;;  %861 = vmax.xlane.f32.xlu0 %v832_v54 }
 0x1f7   :  { %865 = vmax.xlane.f32.xlu0 %v834_v55 }
 0x264   :  { %v840_v56 = vpop.xlane.xlu0 %839 }
 0x265   :  { %v1648_v57 = vsub.f32 %v1555_v7, %v840_v56 }
 0x267   :  { %v887_v58 = vmul.f32 1.442695, %v1648_v57  ;;  %v838_v59 = vpop.xlane.xlu1 %837 }
 0x268   :  { %v836_v60 = vpop.xlane.xlu0 %835  ;;  %v1656_v0 = vsub.f32 %v1564_v11, %v838_v59 }
 0x269   :  { %1275 = vpow2.f32 %v887_v58  ;;  %v1652_v61 = vsub.f32 %v1561_v10, %v836_v60 }
 0x26a   :  { %v885_v7 = vmul.f32 1.442695, %v1656_v0 }
 0x26b   :  { %v883_v63 = vmul.f32 1.442695, %v1652_v61 }
 0x26c   :  { %v848_v1 = vpop.xlane.xlu1 %847  ;;  %v842_v2 = vpop.xlane.xlu0 %841 }
 0x26d   :  { %1277 = vpow2.f32 %v883_v63  ;;  %v1658_v3 = vsub.f32 %v806_v22, %v848_v1  ;;  %v1661_v4 = vsub.f32 %v1573_v17, %v842_v2 }
 0x26f   :  { %v895_v5 = vmul.f32 1.442695, %v1658_v3  ;;  %v889_v6 = vmul.f32 1.442695, %v1661_v4 }
 0x270   :  { %v844_v8 = vpop.xlane.xlu1 %843  ;;  %v850_v9 = vpop.xlane.xlu0 %849 }
 0x271   :  { %1279 = vpow2.f32 %v895_v5  ;;  %v1667_v10 = vsub.f32 %v1582_v26, %v844_v8  ;;  %v1670_v11 = vsub.f32 %v1585_v27, %v850_v9 }
 0x272   :  { %1281 = vpow2.f32 %v889_v6 }
 0x273   :  { %v1276_v12 = vpop.eup %1275  ;;  %v891_v13 = vmul.f32 1.442695, %v1667_v10  ;;  %1283 = vpow2.f32 %v885_v7  ;;  %v897_v14 = vmul.f32 1.442695, %v1670_v11 }
 0x274   :  { %v856_v15 = vpop.xlane.xlu1 %855  ;;  %v846_v16 = vpop.xlane.xlu0 %845  ;;  %v917_v17 = vsel %vm818_vm0, %v1276_v12, 0.0 }
 0x275   :  { %1285 = vpow2.f32 %v891_v13  ;;  %v1677_v18 = vsub.f32 %v1588_v29, %v856_v15  ;;  %v1680_v19 = vsub.f32 %v1597_v33, %v846_v16  ;;  %935 = vadd.xlane.f32.xlu1 %v917_v17 }
 0x276   :  { %1287 = vpow2.f32 %v897_v14 }
 0x277   :  { %v1278_v20 = vpop.eup %1277  ;;  %v903_v21 = vmul.f32 1.442695, %v1677_v18  ;;  %v893_v22 = vmul.f32 1.442695, %v1680_v19 }
 0x278   :  { %v852_v23 = vpop.xlane.xlu1 %851  ;;  %v858_v24 = vpop.xlane.xlu0 %857  ;;  %v915_v25 = vsel %vm818_vm0, %v1278_v20, 0.0 }
 0x279   :  { %1289 = vpow2.f32 %v903_v21  ;;  %v1687_v26 = vsub.f32 %v1600_v36, %v852_v23  ;;  %v1690_v27 = vsub.f32 %v1603_v37, %v858_v24  ;;  %931 = vadd.xlane.f32.xlu1 %v915_v25 }
 0x27a   :  { %1291 = vpow2.f32 %v893_v22 }
 0x27b   :  { %v1280_v28 = vpop.eup %1279  ;;  %v899_v29 = vmul.f32 1.442695, %v1687_v26  ;;  %v905_v31 = vmul.f32 1.442695, %v1690_v27 }
 0x27c   :  { %v1282_v30 = vpop.eup %1281  ;;  %v854_v32 = vpop.xlane.xlu0 %853  ;;  %v921_v34 = vsel %vm818_vm0, %v1280_v28, 0.0 }
 0x27d   :  { %v860_v33 = vpop.xlane.xlu1 %859  ;;  %1293 = vpow2.f32 %v899_v29  ;;  %v1697_v35 = vsub.f32 %v1612_v41, %v854_v32  ;;  %943 = vadd.xlane.f32.xlu1 %v921_v34  ;;  %v918_v37 = vsel %vm818_vm0, %v1282_v30, 0.0  ;;  %v1284_v38 = vpop.eup %1283 }
 0x27e   :  { %v1700_v36 = vsub.f32 %v1621_v45, %v860_v33  ;;  %937 = vadd.xlane.f32.xlu0 %v918_v37  ;;  %1295 = vpow2.f32 %v905_v31  ;;  %v916_v47 = vsel %vm818_vm0, %v1284_v38, 0.0 }
 0x27f   :  { %v1286_v39 = vpop.eup %1285  ;;  %v901_v42 = vmul.f32 1.442695, %v1697_v35 }
 0x280   :  { %v907_v40 = vmul.f32 1.442695, %v1700_v36  ;;  %v862_v44 = vpop.xlane.xlu0 %861  ;;  %v919_v41 = vsel %vm818_vm0, %v1286_v39, 0.0  ;;  %v1288_v48 = vpop.eup %1287 }
 0x281   :  { %v864_v43 = vpop.xlane.xlu1 %863  ;;  %v1712_v46 = vsub.f32 %v1630_v50, %v862_v44  ;;  %939 = vadd.xlane.f32.xlu1 %v919_v41  ;;  %v922_v56 = vsel %vm818_vm0, %v1288_v48, 0.0 }
 0x282   :  { %v1709_v45 = vsub.f32 %v1627_v49, %v864_v43  ;;  %1297 = vpow2.f32 %v907_v40  ;;  %933 = vadd.xlane.f32.xlu0 %v916_v47 }
 0x283   :  { %v1290_v51 = vpop.eup %1289  ;;  %1299 = vpow2.f32 %v901_v42  ;;  %v909_v54 = vmul.f32 1.442695, %v1712_v46 }
 0x284   :  { %v911_v53 = vmul.f32 1.442695, %v1709_v45  ;;  %v866_v55 = vpop.xlane.xlu0 %865  ;;  %v925_v49 = vsel %vm818_vm0, %v1290_v51, 0.0  ;;  %v1292_v58 = vpop.eup %1291 }
 0x285   :  { %v1721_v50 = vsub.f32 %v1636_v52, %v866_v55  ;;  %951 = vadd.xlane.f32.xlu1 %v925_v49  ;;  %v920_v1 = vsel %vm818_vm0, %v1292_v58, 0.0 }
 0x286   :  { %1301 = vpow2.f32 %v911_v53  ;;  %945 = vadd.xlane.f32.xlu0 %v922_v56 }
 0x287   :  { %v1294_v59 = vpop.eup %1293  ;;  %1303 = vpow2.f32 %v909_v54  ;;  %v913_v60 = vmul.f32 1.442695, %v1721_v50 }
 0x288   :  { %v923_v63 = vsel %vm818_vm0, %v1294_v59, 0.0  ;;  %v1296_v2 = vpop.eup %1295 }
 0x289   :  { %947 = vadd.xlane.f32.xlu1 %v923_v63  ;;  %1305 = vpow2.f32 %v913_v60  ;;  %v926_v6 = vsel %vm818_vm0, %v1296_v2, 0.0 }
 0x28a   :  { %941 = vadd.xlane.f32.xlu0 %v920_v1 }
 0x28c   :  { %v1298_v52 = vpop.eup %1297 }
 0x28d   :  { %v927_v5 = vsel %vm818_vm0, %v1298_v52, 0.0  ;;  %v1300_v7 = vpop.eup %1299 }
 0x28e   :  { %955 = vadd.xlane.f32.xlu1 %v927_v5  ;;  %953 = vadd.xlane.f32.xlu0 %v926_v6  ;;  %v924_v12 = vsel %vm818_vm0, %v1300_v7, 0.0 }
 0x290   :  { %v1302_v8 = vpop.eup %1301 }
 0x291   :  { %v929_v9 = vsel %vm818_vm0, %v1302_v8, 0.0  ;;  %v1304_v13 = vpop.eup %1303 }
 0x292   :  { %959 = vadd.xlane.f32.xlu1 %v929_v9  ;;  %949 = vadd.xlane.f32.xlu0 %v924_v12  ;;  %v928_v14 = vsel %vm818_vm0, %v1304_v13, 0.0 }
 0x293   :  { %v1306_v15 = vpop.eup %1305 }
 0x294   :  { %v930_v16 = vsel %vm818_vm0, %v1306_v15, 0.0 }
 0x296   :  { %957 = vadd.xlane.f32.xlu0 %v928_v14 }
 0x29a   :  { %961 = vadd.xlane.f32.xlu0 %v930_v16 }
 0x302   :  { %v936_v17 = vpop.xlane.xlu1 %935 }
 0x303   :  { %1307 = vlog2.f32 %v936_v17 }
 0x306   :  { %v932_v20 = vpop.xlane.xlu1 %931 }
 0x307   :  { %1309 = vlog2.f32 %v932_v20 }
 0x30a   :  { %v944_v21 = vpop.xlane.xlu1 %943 }
 0x30b   :  { %1311 = vlog2.f32 %v944_v21  ;;  %v938_v22 = vpop.xlane.xlu0 %937 }
 0x30c   :  { %1313 = vlog2.f32 %v938_v22 }
 0x30d   :  { %v1308_v23 = vpop.eup %1307 }
 0x30e   :  { %v968_v24 = vmul.f32 0.6931472, %v1308_v23  ;;  %v940_v25 = vpop.xlane.xlu1 %939 }
 0x30f   :  { %1315 = vlog2.f32 %v940_v25  ;;  %v934_v28 = vpop.xlane.xlu0 %933 }
 0x310   :  { %v997_v29 = vsub.f32 %v1648_v57, %v968_v24  ;;  %1317 = vlog2.f32 %v934_v28 }
 0x311   :  { %v1310_v30 = vpop.eup %1309 }
 0x312   :  { %1013 = vst [vmem:[%s1813_s7 + $0x10] sm:$0xff] %v997_v29  ;;  %v964_v62 = vmul.f32 0.6931472, %v1310_v30  ;;  %v952_v31 = vpop.xlane.xlu1 %951 }
 0x313   :  { %1319 = vlog2.f32 %v952_v31  ;;  %v946_v32 = vpop.xlane.xlu0 %945 }
 0x314   :  { %v995_v33 = vsub.f32 %v1652_v61, %v964_v62  ;;  %1321 = vlog2.f32 %v946_v32 }
 0x315   :  { %v1312_v34 = vpop.eup %1311 }
 0x316   :  { %v1314_v37 = vpop.eup %1313  ;;  %1011 = vst [vmem:[%s1813_s7] sm:$0xff] %v995_v33  ;;  %v976_v57 = vmul.f32 0.6931472, %v1312_v34  ;;  %v948_v38 = vpop.xlane.xlu1 %947 }
 0x317   :  { %v970_v39 = vmul.f32 0.6931472, %v1314_v37  ;;  %1323 = vlog2.f32 %v948_v38  ;;  %v942_v40 = vpop.xlane.xlu0 %941 }
 0x318   :  { %v1001_v42 = vsub.f32 %v1658_v3, %v976_v57  ;;  %1325 = vlog2.f32 %v942_v40 }
 0x319   :  { %v1316_v43 = vpop.eup %1315  ;;  %v998_v44 = vsub.f32 %v1661_v4, %v970_v39 }
 0x31a   :  { %v1318_v41 = vpop.eup %1317  ;;  %1017 = vst [vmem:[%s1813_s7 + $0x30] sm:$0xff] %v1001_v42  ;;  %v972_v61 = vmul.f32 0.6931472, %v1316_v43 }
 0x31b   :  { %1014 = vst [vmem:[%s1813_s7 + $0x18] sm:$0xff] %v998_v44  ;;  %v966_v47 = vmul.f32 0.6931472, %v1318_v41  ;;  %v956_v48 = vpop.xlane.xlu1 %955  ;;  %v954_v51 = vpop.xlane.xlu0 %953 }
 0x31c   :  { %v999_v53 = vsub.f32 %v1667_v10, %v972_v61  ;;  %1327 = vlog2.f32 %v956_v48 }
 0x31d   :  { %v1320_v3 = vpop.eup %1319  ;;  %v996_v54 = vsub.f32 %v1656_v0, %v966_v47  ;;  %1329 = vlog2.f32 %v954_v51 }
 0x31e   :  { %v1322_v4 = vpop.eup %1321  ;;  %1015 = vst [vmem:[%s1813_s7 + $0x20] sm:$0xff] %v999_v53  ;;  %v984_v55 = vmul.f32 0.6931472, %v1320_v3 }
 0x31f   :  { %1012 = vst [vmem:[%s1813_s7 + $0x8] sm:$0xff] %v996_v54  ;;  %v978_v49 = vmul.f32 0.6931472, %v1322_v4  ;;  %v960_v56 = vpop.xlane.xlu1 %959  ;;  %v950_v58 = vpop.xlane.xlu0 %949 }
 0x320   :  { %v1005_v10 = vsub.f32 %v1677_v18, %v984_v55  ;;  %1331 = vlog2.f32 %v960_v56 }
 0x321   :  { %v1324_v59 = vpop.eup %1323  ;;  %v1002_v0 = vsub.f32 %v1670_v11, %v978_v49  ;;  %1333 = vlog2.f32 %v950_v58 }
 0x322   :  { %v1326_v60 = vpop.eup %1325  ;;  %1021 = vst [vmem:[%s1813_s7 + $0x50] sm:$0xff] %v1005_v10  ;;  %v980_v63 = vmul.f32 0.6931472, %v1324_v59 }
 0x323   :  { %1018 = vst [vmem:[%s1813_s7 + $0x38] sm:$0xff] %v1002_v0  ;;  %v974_v1 = vmul.f32 0.6931472, %v1326_v60  ;;  %v958_v2 = vpop.xlane.xlu0 %957 }
 0x324   :  { %v1003_v52 = vsub.f32 %v1687_v26, %v980_v63  ;;  %1335 = vlog2.f32 %v958_v2 }
 0x325   :  { %v1000_v18 = vsub.f32 %v1680_v19, %v974_v1 }
 0x326   :  { %v1328_v5 = vpop.eup %1327  ;;  %1019 = vst [vmem:[%s1813_s7 + $0x40] sm:$0xff] %v1003_v52 }
 0x327   :  { %v1330_v11 = vpop.eup %1329  ;;  %1016 = vst [vmem:[%s1813_s7 + $0x28] sm:$0xff] %v1000_v18  ;;  %v988_v6 = vmul.f32 0.6931472, %v1328_v5  ;;  %v962_v7 = vpop.xlane.xlu0 %961 }
 0x328   :  { %v986_v8 = vmul.f32 0.6931472, %v1330_v11  ;;  %1337 = vlog2.f32 %v962_v7 }
 0x329   :  { %v1007_v9 = vsub.f32 %v1700_v36, %v988_v6 }
 0x32a   :  { %v1332_v26 = vpop.eup %1331  ;;  %v1006_v12 = vsub.f32 %v1690_v27, %v986_v8 }
 0x32b   :  { %v1334_v19 = vpop.eup %1333  ;;  %1023 = vst [vmem:[%s1813_s7 + $0x60] sm:$0xff] %v1007_v9  ;;  %v992_v13 = vmul.f32 0.6931472, %v1332_v26 }
 0x32c   :  { %1022 = vst [vmem:[%s1813_s7 + $0x58] sm:$0xff] %v1006_v12  ;;  %v982_v14 = vmul.f32 0.6931472, %v1334_v19 }
 0x32d   :  { %v1009_v15 = vsub.f32 %v1709_v45, %v992_v13 }
 0x32e   :  { %v1336_v16 = vpop.eup %1335  ;;  %v1004_v17 = vsub.f32 %v1697_v35, %v982_v14 }
 0x32f   :  { %1025 = vst [vmem:[%s1813_s7 + $0x70] sm:$0xff] %v1009_v15  ;;  %v990_v27 = vmul.f32 0.6931472, %v1336_v16 }
 0x330   :  { %1020 = vst [vmem:[%s1813_s7 + $0x48] sm:$0xff] %v1004_v17 }
 0x331   :  { %v1008_v36 = vsub.f32 %v1712_v46, %v990_v27 }
 0x332   :  { %v1338_v20 = vpop.eup %1337 }
 0x333   :  { %1024 = vst [vmem:[%s1813_s7 + $0x68] sm:$0xff] %v1008_v36  ;;  %v994_v45 = vmul.f32 0.6931472, %v1338_v20 }
 0x335   :  { %v1010_v21 = vsub.f32 %v1721_v50, %v994_v45 }
 0x337   :  { %1026 = vst [vmem:[%s1813_s7 + $0x78] sm:$0xff] %v1010_v21 }

// kernel: graphsage_forward.2
= control target key start
LH: loop header
LB: loop body
LE: loop exit
PB: predicated region body
PF: predicated region fallthrough
CT: control target
= control target key end

     0   :  { %v1239_v1 = vmov 0   ;;  %s1485_s1 = inlined_call_operand.vmem [shape: bf16[128,128], index: 1, kind: input, shape index: {}, may-alias: {1,2}]   ;;  %s1486_s0 = inlined_call_operand.vmem [shape: s8[128,128], index: 0, kind: input, shape index: {}]   ;;  %s1487_s3 = inlined_call_operand.vmem [shape: f32[128,1], index: 3, kind: input, shape index: {}]   ;;  %s1488_s5 = inlined_call_operand.vmem [shape: bf16[128,128], index: 5, kind: input, shape index: {}]   ;;  %s1489_s4 = inlined_call_operand.vmem [shape: bf16[128,128], index: 4, kind: input, shape index: {}]   ;;  %s1490_s2 = inlined_call_operand.vmem [shape: bf16[128,128], index: 2, kind: input, shape index: {}, may-alias: {1,2}]   ;;  %s1491_s6 = inlined_call_operand.vmem [shape: f32[1,128], index: 6, kind: input, shape index: {}]   ;;  %s1492_s7 = inlined_call_operand.vmem [shape: bf16[128,128], index: 7, kind: output, shape index: {}]  }
   0x1   :  { %v1207_v0 = vld [vmem:[%s1485_s1] sm:$0xff]   ;;  %1206 = vset.pattern.permute.xlu1 %v1239_v1  ;;  %1205 = vset.pattern.permute.xlu0 %v1239_v1  ;;  %v1208_v2 = vld [vmem:[%s1485_s1 + $0x8] sm:$0xff]   ;;  %v1209_v3 = vld [vmem:[%s1485_s1 + $0x10] sm:$0xff]  }
   0x2   :  { %1076 = vmatprep.subr.bf16.mxu0 %v1207_v0  ;;  %v1210_v4 = vld [vmem:[%s1485_s1 + $0x18] sm:$0xff]   ;;  %v1295_v5 = vld [vmem:[%s1486_s0] sm:$0xff]  ;;  %v289_v7 = vld [vmem:[%s1487_s3 + $0x10] sm:$0xff] }
   0x3   :  { %1077 = vmatpush3.bf16.msra.mxu0 %v1207_v0  ;;  %v67_v6 = vunpack.c.l.s8.bf16 %v1295_v5  ;;  %v287_v8 = vld [vmem:[%s1487_s3] sm:$0xff]  ;;  %315 = vperm.xlu1 %1206, %v289_v7   ;;  %v290_v9 = vld [vmem:[%s1487_s3 + $0x18] sm:$0xff]  ;;  %v288_v10 = vld [vmem:[%s1487_s3 + $0x8] sm:$0xff]  ;;  %v68_v32 = vunpack.c.h.s8.bf16 %v1295_v5 }
   0x4   :  { %1078 = vmatprep.subr.bf16.mxu0 %v1208_v2  ;;  %305 = vperm.xlu0 %1205, %v287_v8   ;;  %v1211_v11 = vld [vmem:[%s1485_s1 + $0x20] sm:$0xff]   ;;  %v1212_v12 = vld [vmem:[%s1485_s1 + $0x28] sm:$0xff]   ;;  %v1213_v17 = vld [vmem:[%s1485_s1 + $0x30] sm:$0xff]  }
   0x5   :  { %1092 = vmatprep.mubr.bf16.mxu0 %v67_v6  ;;  %v296_v13 = vld [vmem:[%s1487_s3 + $0x48] sm:$0xff]  ;;  %v295_v14 = vld [vmem:[%s1487_s3 + $0x40] sm:$0xff]  ;;  %v298_v18 = vld [vmem:[%s1487_s3 + $0x58] sm:$0xff] }
   0x6   :  { %v1215_v15 = vld [vmem:[%s1488_s5] sm:$0xff]   ;;  %v1216_v16 = vld [vmem:[%s1488_s5 + $0x8] sm:$0xff]   ;;  %v297_v19 = vld [vmem:[%s1487_s3 + $0x50] sm:$0xff] }
   0x7   :  { %1079 = vmatpush3.bf16.msra.mxu0 %v1208_v2  ;;  %320 = vperm.xlu1 %1206, %v290_v9   ;;  %v1217_v20 = vld [vmem:[%s1488_s5 + $0x10] sm:$0xff]   ;;  %v1214_v21 = vld [vmem:[%s1485_s1 + $0x38] sm:$0xff]   ;;  %v292_v22 = vld [vmem:[%s1487_s3 + $0x28] sm:$0xff] }
   0x8   :  { %1080 = vmatprep.subr.bf16.mxu0 %v1209_v3  ;;  %310 = vperm.xlu0 %1205, %v288_v10   ;;  %v291_v23 = vld [vmem:[%s1487_s3 + $0x20] sm:$0xff]  ;;  %v1218_v24 = vld [vmem:[%s1488_s5 + $0x18] sm:$0xff]   ;;  %v293_v26 = vld [vmem:[%s1487_s3 + $0x30] sm:$0xff] }
   0x9   :  { %1108 = vmatprep.subr.bf16.mxu1 %v1215_v15  ;;  %v294_v25 = vld [vmem:[%s1487_s3 + $0x38] sm:$0xff]  ;;  %v64_v27 = vld [vmem:[%s1486_s0 + $0x8] sm:$0xff]  ;;  %v1226_v28 = vld [vmem:[%s1490_s2] sm:$0xff]  }
   0xa   :  { %1109 = vmatpush3.bf16.msra.mxu1 %v1215_v15  ;;  %v1219_v29 = vld [vmem:[%s1488_s5 + $0x20] sm:$0xff]   ;;  %v300_v31 = vld [vmem:[%s1487_s3 + $0x68] sm:$0xff]  ;;  %1124 = vmatprep.mubr.bf16.mxu1 %v1226_v28  ;;  %v69_v34 = vunpack.c.l.s8.bf16 %v64_v27  ;;  %v65_v37 = vld [vmem:[%s1486_s0 + $0x10] sm:$0xff]  ;;  %v70_v42 = vunpack.c.h.s8.bf16 %v64_v27 }
   0xb   :  { %1081 = vmatpush3.bf16.msra.mxu0 %v1209_v3  ;;  %350 = vperm.xlu1 %1206, %v296_v13   ;;  %v1220_v30 = vld [vmem:[%s1489_s4] sm:$0xff]   ;;  %v1221_v35 = vld [vmem:[%s1488_s5 + $0x28] sm:$0xff]   ;;  %v302_v38 = vld [vmem:[%s1487_s3 + $0x78] sm:$0xff]  ;;  %v71_v43 = vunpack.c.l.s8.bf16 %v65_v37  ;;  %v72_v48 = vunpack.c.h.s8.bf16 %v65_v37 }
   0xc   :  { %1082 = vmatprep.subr.bf16.mxu0 %v1210_v4  ;;  %345 = vperm.xlu0 %1205, %v295_v14   ;;  %v299_v33 = vld [vmem:[%s1487_s3 + $0x60] sm:$0xff]  ;;  %v1222_v36 = vld [vmem:[%s1489_s4 + $0x8] sm:$0xff]   ;;  %v301_v39 = vld [vmem:[%s1487_s3 + $0x70] sm:$0xff] }
   0xd   :  { %1110 = vmatprep.subr.bf16.mxu1 %v1216_v16  ;;  %v1223_v40 = vld [vmem:[%s1488_s5 + $0x30] sm:$0xff]   ;;  %v1225_v44 = vld [vmem:[%s1488_s5 + $0x38] sm:$0xff]   ;;  %v1229_v47 = vld [vmem:[%s1489_s4 + $0x20] sm:$0xff]  }
   0xe   :  { %1111 = vmatpush3.bf16.msra.mxu1 %v1216_v16  ;;  %v1224_v41 = vld [vmem:[%s1489_s4 + $0x10] sm:$0xff]   ;;  %v1227_v45 = vld [vmem:[%s1489_s4 + $0x18] sm:$0xff]   ;;  %v1228_v50 = vld [vmem:[%s1490_s2 + $0x8] sm:$0xff]  }
   0xf   :  { %1083 = vmatpush3.bf16.msra.mxu0 %v1210_v4  ;;  %360 = vperm.xlu1 %1206, %v298_v18   ;;  %v66_v46 = vld [vmem:[%s1486_s0 + $0x18] sm:$0xff]  ;;  %v1230_v51 = vld [vmem:[%s1490_s2 + $0x10] sm:$0xff]   ;;  %v1231_v52 = vld [vmem:[%s1489_s4 + $0x28] sm:$0xff]  }
  0x10   :  { %1084 = vmatprep.subr.bf16.mxu0 %v1211_v11  ;;  %355 = vperm.xlu0 %1205, %v297_v19   ;;  %v73_v49 = vunpack.c.l.s8.bf16 %v66_v46  ;;  %v74_v53 = vunpack.c.h.s8.bf16 %v66_v46  ;;  %v1232_v54 = vld [vmem:[%s1490_s2 + $0x18] sm:$0xff]   ;;  %v1233_v55 = vld [vmem:[%s1489_s4 + $0x30] sm:$0xff]   ;;  %v1235_v57 = vld [vmem:[%s1490_s2 + $0x20] sm:$0xff]  }
  0x11   :  { %1112 = vmatprep.subr.bf16.mxu1 %v1217_v20  ;;  %v1234_v56 = vld [vmem:[%s1489_s4 + $0x38] sm:$0xff]   ;;  %v1236_v58 = vld [vmem:[%s1490_s2 + $0x28] sm:$0xff]   ;;  %v1237_v59 = vld [vmem:[%s1490_s2 + $0x30] sm:$0xff]  }
  0x12   :  { %1113 = vmatpush3.bf16.msra.mxu1 %v1217_v20  ;;  %v1238_v60 = vld [vmem:[%s1490_s2 + $0x38] sm:$0xff]  }
  0x13   :  { %1085 = vmatpush3.bf16.msra.mxu0 %v1211_v11  ;;  %330 = vperm.xlu1 %1206, %v292_v22  }
  0x14   :  { %1086 = vmatprep.subr.bf16.mxu0 %v1212_v12  ;;  %325 = vperm.xlu0 %1205, %v291_v23  }
  0x15   :  { %1114 = vmatprep.subr.bf16.mxu1 %v1218_v24 }
  0x16   :  { %1115 = vmatpush3.bf16.msra.mxu1 %v1218_v24 }
  0x17   :  { %1087 = vmatpush3.bf16.msra.mxu0 %v1212_v12  ;;  %340 = vperm.xlu1 %1206, %v294_v25  }
  0x18   :  { %1088 = vmatprep.subr.bf16.mxu0 %v1213_v17  ;;  %335 = vperm.xlu0 %1205, %v293_v26  }
  0x19   :  { %1116 = vmatprep.subr.bf16.mxu1 %v1219_v29 }
  0x1a   :  { %1117 = vmatpush3.bf16.msra.mxu1 %v1219_v29 }
  0x1b   :  { %1089 = vmatpush3.bf16.msra.mxu0 %v1213_v17  ;;  %370 = vperm.xlu1 %1206, %v300_v31  }
  0x1c   :  { %1090 = vmatprep.subr.bf16.mxu0 %v1214_v21  ;;  %365 = vperm.xlu0 %1205, %v299_v33  }
  0x1d   :  { %1118 = vmatprep.subr.bf16.mxu1 %v1221_v35 }
  0x1e   :  { %1119 = vmatpush3.bf16.msra.mxu1 %v1221_v35 }
  0x1f   :  { %1091 = vmatpush3.bf16.msra.mxu0 %v1214_v21  ;;  %380 = vperm.xlu1 %1206, %v302_v38  }
  0x20   :  { %1140 = vmatprep.subr.bf16.mxu0 %v1220_v30  ;;  %375 = vperm.xlu0 %1205, %v301_v39  }
  0x21   :  { %1120 = vmatprep.subr.bf16.mxu1 %v1223_v40 }
  0x22   :  { %1093 = vmatmul.mubr.bf16.vlgmr.msra.gmra.mrb[0].mxu0 %v68_v32  ;;  %1121 = vmatpush3.bf16.msra.mxu1 %v1223_v40 }
  0x23   :  { %1096 = vmatprep.mubr.bf16.mxu0 %v69_v34  ;;  %1141 = vmatpush3.bf16.msra.mxu0 %v1220_v30 }
  0x24   :  { %1142 = vmatprep.subr.bf16.mxu0 %v1222_v36  ;;  %1122 = vmatprep.subr.bf16.mxu1 %v1225_v44 }
  0x26   :  { %1123 = vmatpush3.bf16.msra.mxu1 %v1225_v44 }
  0x27   :  { %1143 = vmatpush3.bf16.msra.mxu0 %v1222_v36  ;;  %1172 = vmatprep.subr.bf16.mxu1 %v1220_v30 }
  0x28   :  { %1144 = vmatprep.subr.bf16.mxu0 %v1224_v41 }
  0x29   :  { %1125 = vmatmul.mubr.bf16.vlgmr.msra.gmra.mrb[0].mxu1 %v1228_v50 }
  0x2a   :  { %1097 = vmatmul.mubr.bf16.gmra.mrb[4].mxu0 %v70_v42  ;;  %1180 = vmatpush3.bf16.msra.mxu1 %v1220_v30 }
  0x2b   :  { %1100 = vmatprep.mubr.bf16.mxu0 %v71_v43  ;;  %1145 = vmatpush3.bf16.msra.mxu0 %v1224_v41 }
  0x2c   :  { %1146 = vmatprep.subr.bf16.mxu0 %v1227_v45  ;;  %1173 = vmatprep.subr.bf16.mxu1 %v1222_v36 }
  0x2d   :  { %1128 = vmatprep.mubr.bf16.mxu1 %v1230_v51 }
  0x2e   :  { %1181 = vmatpush3.bf16.msra.mxu1 %v1222_v36 }
  0x2f   :  { %1147 = vmatpush3.bf16.msra.mxu0 %v1227_v45  ;;  %1174 = vmatprep.subr.bf16.mxu1 %v1224_v41 }
  0x30   :  { %1148 = vmatprep.subr.bf16.mxu0 %v1229_v47 }
  0x31   :  { %1129 = vmatmul.mubr.bf16.gmra.mrb[4].mxu1 %v1232_v54 }
  0x32   :  { %1101 = vmatmul.mubr.bf16.gmra.mrb[8].mxu0 %v72_v48  ;;  %1182 = vmatpush3.bf16.msra.mxu1 %v1224_v41 }
  0x33   :  { %1104 = vmatprep.mubr.bf16.mxu0 %v73_v49  ;;  %1149 = vmatpush3.bf16.msra.mxu0 %v1229_v47 }
  0x34   :  { %1150 = vmatprep.subr.bf16.mxu0 %v1231_v52  ;;  %1175 = vmatprep.subr.bf16.mxu1 %v1227_v45 }
  0x35   :  { %1132 = vmatprep.mubr.bf16.mxu1 %v1235_v57 }
  0x36   :  { %1183 = vmatpush3.bf16.msra.mxu1 %v1227_v45 }
  0x37   :  { %1151 = vmatpush3.bf16.msra.mxu0 %v1231_v52  ;;  %1176 = vmatprep.subr.bf16.mxu1 %v1229_v47 }
  0x38   :  { %1152 = vmatprep.subr.bf16.mxu0 %v1233_v55 }
  0x39   :  { %1133 = vmatmul.mubr.bf16.gmra.mrb[8].mxu1 %v1236_v58 }
  0x3a   :  { %1105 = vmatmul.mubr.bf16.gmra.mrb[12].mxu0 %v74_v53  ;;  %1184 = vmatpush3.bf16.msra.mxu1 %v1229_v47 }
  0x3b   :  { %1177 = vmatprep.subr.bf16.mxu1 %v1231_v52  ;;  %1153 = vmatpush3.bf16.msra.mxu0 %v1233_v55 }
  0x3c   :  { %1154 = vmatprep.subr.bf16.mxu0 %v1234_v56  ;;  %1136 = vmatprep.mubr.bf16.mxu1 %v1237_v59 }
  0x3e   :  { %1185 = vmatpush3.bf16.msra.mxu1 %v1231_v52 }
  0x3f   :  { %1178 = vmatprep.subr.bf16.mxu1 %v1233_v55  ;;  %1155 = vmatpush3.bf16.msra.mxu0 %v1234_v56 }
  0x41   :  { %1137 = vmatmul.mubr.bf16.gmra.mrb[12].mxu1 %v1238_v60 }
  0x42   :  { %1186 = vmatpush3.bf16.msra.mxu1 %v1233_v55 }
  0x43   :  { %1179 = vmatprep.subr.bf16.mxu1 %v1234_v56 }
  0x46   :  { %1187 = vmatpush3.bf16.msra.mxu1 %v1234_v56 }
  0x82   :  { %v316_v61 = vpop.permute.xlu1 %315 }
  0x83   :  { %v306_v62 = vpop.permute.xlu0 %305 }
  0x86   :  { %v321_v63 = vpop.permute.xlu1 %320 }
  0x87   :  { %v311_v0 = vpop.permute.xlu0 %310 }
  0x8a   :  { %v351_v1 = vpop.permute.xlu1 %350 }
  0x8b   :  { %v346_v2 = vpop.permute.xlu0 %345 }
  0x8e   :  { %v361_v3 = vpop.permute.xlu1 %360 }
  0x8f   :  { %v356_v4 = vpop.permute.xlu0 %355 }
  0x92   :  { %v331_v8 = vpop.permute.xlu1 %330 }
  0x93   :  { %v326_v12 = vpop.permute.xlu0 %325 }
  0x96   :  { %v341_v18 = vpop.permute.xlu1 %340 }
  0x97   :  { %v336_v20 = vpop.permute.xlu0 %335 }
  0x9a   :  { %v371_v29 = vpop.permute.xlu1 %370 }
  0x9b   :  { %v366_v30 = vpop.permute.xlu0 %365 }
  0x9e   :  { %v381_v45 = vpop.permute.xlu1 %380 }
  0x9f   :  { %v376_v46 = vpop.permute.xlu0 %375 }
  0xf5   :  { %v1094_v5 = vpop.f32.mrb[0].mxu0 }
  0xf6   :  { %v173_v6 = vpop.f32.mrb[1].mxu0  ;;  %v385_v9 = vmul.f32 %v1094_v5, %v316_v61 }
  0xf7   :  { %v1095_v7 = vpop.f32.mrb[2].mxu0  ;;  %v383_v13 = vmul.f32 %v306_v62, %v173_v6  ;;  %v1443_v62 = vld [vmem:[%s1491_s6] ss:$0 sm:$0xff] }
  0xf8   :  { %v386_v10 = vmul.f32 %v1095_v7, %v321_v63  ;;  %v176_v11 = vpop.f32.mrb[3].mxu0 }
  0xf9   :  { %v384_v14 = vmul.f32 %v311_v0, %v176_v11 }
  0xfa   :  { %v400_v15 = vpack.c.bf16 %v386_v10, %v385_v9 }
  0xfb   :  { %v399_v16 = vpack.c.bf16 %v384_v14, %v383_v13 }
  0xfc   :  { %v1126_v33 = vpop.f32.mrb[0].mxu1 }
  0xfd   :  { %v1098_v17 = vpop.f32.mrb[4].mxu0  ;;  %1156 = vmatprep.mubr.bf16.mxu0 %v399_v16  ;;  %v585_v35 = vpop.f32.mrb[1].mxu1 }
  0xfe   :  { %v189_v19 = vpop.f32.mrb[5].mxu0  ;;  %1157 = vmatmul.mubr.bf16.vlgmr.msra.gmra.mrb[16].mxu0 %v400_v15  ;;  %v389_v22 = vmul.f32 %v1098_v17, %v336_v20  ;;  %v1127_v39 = vpop.f32.mrb[2].mxu1 }
  0xff   :  { %v1099_v21 = vpop.f32.mrb[6].mxu0  ;;  %v387_v25 = vmul.f32 %v326_v12, %v189_v19  ;;  %v588_v42 = vpop.f32.mrb[3].mxu1 }
 0x100   :  { %v390_v23 = vmul.f32 %v1099_v21, %v341_v18  ;;  %v192_v24 = vpop.f32.mrb[7].mxu0 }
 0x101   :  { %v388_v26 = vmul.f32 %v331_v8, %v192_v24 }
 0x102   :  { %v402_v27 = vpack.c.bf16 %v390_v23, %v389_v22 }
 0x103   :  { %v401_v28 = vpack.c.bf16 %v388_v26, %v387_v25 }
 0x104   :  { %v1130_v49 = vpop.f32.mrb[4].mxu1 }
 0x105   :  { %v1102_v31 = vpop.f32.mrb[8].mxu0  ;;  %1160 = vmatprep.mubr.bf16.mxu0 %v401_v28  ;;  %v601_v51 = vpop.f32.mrb[5].mxu1 }
 0x106   :  { %v205_v32 = vpop.f32.mrb[9].mxu0  ;;  %1161 = vmatmul.mubr.bf16.gmra.mrb[20].mxu0 %v402_v27  ;;  %v393_v36 = vmul.f32 %v1102_v31, %v356_v4  ;;  %v1131_v55 = vpop.f32.mrb[6].mxu1 }
 0x107   :  { %v1103_v34 = vpop.f32.mrb[10].mxu0  ;;  %v391_v40 = vmul.f32 %v346_v2, %v205_v32  ;;  %v604_v58 = vpop.f32.mrb[7].mxu1 }
 0x108   :  { %v394_v37 = vmul.f32 %v1103_v34, %v361_v3  ;;  %v208_v38 = vpop.f32.mrb[11].mxu0 }
 0x109   :  { %v392_v41 = vmul.f32 %v351_v1, %v208_v38 }
 0x10a   :  { %v404_v43 = vpack.c.bf16 %v394_v37, %v393_v36 }
 0x10b   :  { %v403_v44 = vpack.c.bf16 %v392_v41, %v391_v40 }
 0x10d   :  { %v1106_v47 = vpop.f32.mrb[12].mxu0  ;;  %1164 = vmatprep.mubr.bf16.mxu1 %v403_v44 }
 0x10e   :  { %v221_v48 = vpop.f32.mrb[13].mxu0  ;;  %1165 = vmatmul.mubr.bf16.vlgmr.msra.gmra.mrb[8].mxu1 %v404_v43  ;;  %v397_v52 = vmul.f32 %v1106_v47, %v376_v46 }
 0x10f   :  { %v1107_v50 = vpop.f32.mrb[14].mxu0  ;;  %v395_v56 = vmul.f32 %v366_v30, %v221_v48 }
 0x110   :  { %v398_v53 = vmul.f32 %v1107_v50, %v381_v45  ;;  %v224_v54 = vpop.f32.mrb[15].mxu0 }
 0x111   :  { %v396_v57 = vmul.f32 %v371_v29, %v224_v54 }
 0x112   :  { %v406_v59 = vpack.c.bf16 %v398_v53, %v397_v52 }
 0x113   :  { %v405_v60 = vpack.c.bf16 %v396_v57, %v395_v56 }
 0x115   :  { %1168 = vmatprep.mubr.bf16.mxu1 %v405_v60 }
 0x116   :  { %1169 = vmatmul.mubr.bf16.gmra.mrb[12].mxu1 %v406_v59 }
 0x1d1   :  { %v1158_v61 = vpop.f32.mrb[16].mxu0 }
 0x1d2   :  { %v739_v63 = vadd.f32 %v1158_v61, %v1126_v33  ;;  %v730_v0 = vpop.f32.mrb[17].mxu0 }
 0x1d3   :  { %v731_v1 = vadd.f32 %v730_v0, %v585_v35  ;;  %v1159_v2 = vpop.f32.mrb[18].mxu0 }
 0x1d4   :  { %v802_v3 = vadd.f32 %v1443_v62, %v739_v63  ;;  %v742_v4 = vadd.f32 %v1159_v2, %v1127_v39  ;;  %v733_v5 = vpop.f32.mrb[19].mxu0 }
 0x1d5   :  { %v800_v6 = vadd.f32 %v1443_v62, %v731_v1  ;;  %v734_v7 = vadd.f32 %v733_v5, %v588_v42 }
 0x1d6   :  { %v803_v8 = vadd.f32 %v1443_v62, %v742_v4  ;;  %v818_v10 = vmax.f32 %v802_v3, 0.0 }
 0x1d7   :  { %v801_v9 = vadd.f32 %v1443_v62, %v734_v7  ;;  %v816_v12 = vmax.f32 %v800_v6, 0.0 }
 0x1d8   :  { %v819_v11 = vmax.f32 %v803_v8, 0.0 }
 0x1d9   :  { %v817_v13 = vmax.f32 %v801_v9, 0.0  ;;  %v1162_v14 = vpop.f32.mrb[20].mxu0 }
 0x1da   :  { %v989_v15 = vpack.c.bf16 %v819_v11, %v818_v10  ;;  %v755_v16 = vadd.f32 %v1162_v14, %v1130_v49  ;;  %v746_v17 = vpop.f32.mrb[21].mxu0 }
 0x1db   :  { %v984_v18 = vpack.c.bf16 %v817_v13, %v816_v12  ;;  %v747_v19 = vadd.f32 %v746_v17, %v601_v51  ;;  %v1163_v20 = vpop.f32.mrb[22].mxu0 }
 0x1dc   :  { %1021 = vst [vmem:[%s1492_s7 + $0x8] sm:$0xff] %v989_v15   ;;  %v806_v21 = vadd.f32 %v1443_v62, %v755_v16  ;;  %v758_v22 = vadd.f32 %v1163_v20, %v1131_v55  ;;  %v749_v23 = vpop.f32.mrb[23].mxu0 }
 0x1dd   :  { %985 = vst [vmem:[%s1492_s7] sm:$0xff] %v984_v18   ;;  %v804_v24 = vadd.f32 %v1443_v62, %v747_v19  ;;  %v750_v25 = vadd.f32 %v749_v23, %v604_v58 }
 0x1de   :  { %v807_v26 = vadd.f32 %v1443_v62, %v758_v22  ;;  %v822_v28 = vmax.f32 %v806_v21, 0.0 }
 0x1df   :  { %v805_v27 = vadd.f32 %v1443_v62, %v750_v25  ;;  %v820_v30 = vmax.f32 %v804_v24, 0.0 }
 0x1e0   :  { %v823_v29 = vmax.f32 %v807_v26, 0.0 }
 0x1e1   :  { %v821_v31 = vmax.f32 %v805_v27, 0.0  ;;  %v1166_v32 = vpop.f32.mrb[8].mxu1 }
 0x1e2   :  { %v999_v33 = vpack.c.bf16 %v823_v29, %v822_v28  ;;  %v810_v34 = vadd.f32 %v1166_v32, %v1443_v62  ;;  %v762_v35 = vpop.f32.mrb[9].mxu1 }
 0x1e3   :  { %v994_v36 = vpack.c.bf16 %v821_v31, %v820_v30  ;;  %v808_v37 = vadd.f32 %v1443_v62, %v762_v35  ;;  %v1167_v38 = vpop.f32.mrb[10].mxu1 }
 0x1e4   :  { %1023 = vst [vmem:[%s1492_s7 + $0x18] sm:$0xff] %v999_v33   ;;  %v811_v39 = vadd.f32 %v1167_v38, %v1443_v62  ;;  %v765_v40 = vpop.f32.mrb[11].mxu1  ;;  %v826_v42 = vmax.f32 %v810_v34, 0.0 }
 0x1e5   :  { %1022 = vst [vmem:[%s1492_s7 + $0x10] sm:$0xff] %v994_v36   ;;  %v809_v41 = vadd.f32 %v1443_v62, %v765_v40  ;;  %v824_v44 = vmax.f32 %v808_v37, 0.0 }
 0x1e6   :  { %v827_v43 = vmax.f32 %v811_v39, 0.0 }
 0x1e7   :  { %v825_v45 = vmax.f32 %v809_v41, 0.0 }
 0x1e8   :  { %v1009_v46 = vpack.c.bf16 %v827_v43, %v826_v42 }
 0x1e9   :  { %v1004_v47 = vpack.c.bf16 %v825_v45, %v824_v44  ;;  %v1170_v48 = vpop.f32.mrb[12].mxu1 }
 0x1ea   :  { %1025 = vst [vmem:[%s1492_s7 + $0x28] sm:$0xff] %v1009_v46   ;;  %v814_v49 = vadd.f32 %v1170_v48, %v1443_v62  ;;  %v778_v50 = vpop.f32.mrb[13].mxu1 }
 0x1eb   :  { %1024 = vst [vmem:[%s1492_s7 + $0x20] sm:$0xff] %v1004_v47   ;;  %v812_v51 = vadd.f32 %v1443_v62, %v778_v50  ;;  %v1171_v52 = vpop.f32.mrb[14].mxu1 }
 0x1ec   :  { %v815_v53 = vadd.f32 %v1171_v52, %v1443_v62  ;;  %v781_v54 = vpop.f32.mrb[15].mxu1  ;;  %v830_v56 = vmax.f32 %v814_v49, 0.0 }
 0x1ed   :  { %v813_v55 = vadd.f32 %v1443_v62, %v781_v54  ;;  %v828_v58 = vmax.f32 %v812_v51, 0.0 }
 0x1ee   :  { %v831_v57 = vmax.f32 %v815_v53, 0.0 }
 0x1ef   :  { %v829_v59 = vmax.f32 %v813_v55, 0.0 }
 0x1f0   :  { %v1019_v60 = vpack.c.bf16 %v831_v57, %v830_v56 }
 0x1f1   :  { %v1014_v61 = vpack.c.bf16 %v829_v59, %v828_v58 }
 0x1f2   :  { %1027 = vst [vmem:[%s1492_s7 + $0x38] sm:$0xff] %v1019_v60  }
 0x1f3   :  { %1026 = vst [vmem:[%s1492_s7 + $0x30] sm:$0xff] %v1014_v61  }

</bundles_post_ra>
